<compile_context>
chip_gen: v7x
topology: tpu7x:2x2x1
jax: 0.10.0
libtpu: 0.0.40
codegen_flags: <defaults>
</compile_context>

<pallas_src>
import functools

import jax
import jax.numpy as jnp
from jax import lax
from jax.experimental import pallas as pl
from jax.experimental.pallas import tpu as pltpu

LANE = 128      # TPU lane width (last dim)
SUBLANE = 8     # f32 sublane count (second-to-last dim)


def _round_up(x, m):
    return (x + m - 1) // m * m


# ----------------------------------------------------------------------------------
# Kernel: grid over decode steps, weights resident in VMEM, hidden carried in scratch.
# ----------------------------------------------------------------------------------
def attn_decoder_kernel(ids_ref,                       # SMEM (T, B_pad) int32 (scalar prefetch)
                        h0_ref, enc_t_ref, gi_tab_ref, w_h_ref, b_hh_ref,
                        w_cat_a_ref, w_cat_b_ref, b_cat_ref, w_out_ref, b_out_ref,
                        out_ref, h_out_ref, attn_ref,
                        h_scr, gi_scr,
                        *, batch):
    t = pl.program_id(0)
    B_pad, H = h0_ref.shape
    L_pad = enc_t_ref.shape[2]

    # hidden state lives in VMEM scratch across the whole decode sequence
    @pl.when(t == 0)
    def _():
        h_scr[...] = h0_ref[...]

    # ---- embedding + GRU input projection fused: gather rows of (V, 3H_pad) gi table
    #      (b_ih already folded in; embedding dropout is identity in eval mode) ----
    for b in range(B_pad):                               # B_pad = 8, static unrolled
        idx = ids_ref[t, b]
        gi_scr[pl.ds(b, 1), :] = gi_tab_ref[pl.ds(idx, 1), :]
    gi = gi_scr[...]                                     # (B_pad, 3H_pad)

    # ---- GRU single step, PyTorch gate order (r, z, n); hidden gates fused ----
    h = h_scr[...]                                       # (B_pad, H)
    gh = jnp.dot(h, w_h_ref[...], preferred_element_type=jnp.float32) + b_hh_ref[...]

    rz = jax.nn.sigmoid(gi[:, :2 * H] + gh[:, :2 * H])   # one EUP pass for r|z slab
    r = rz[:, :H]
    z = rz[:, H:2 * H]
    n = jnp.tanh(gi[:, 2 * H:3 * H] + r * gh[:, 2 * H:3 * H])
    h_new = (1.0 - z) * n + z * h                        # (B_pad, H) == rnn_output
    h_scr[...] = h_new

    # ---- 'dot' attention on VPU/XLU (M=1 batched matmuls avoided):
    #      enc_t is (B_pad, H, L_pad), lane-dense along L ----
    enc_t = enc_t_ref[...]
    energies = jnp.sum(h_new[:, :, None] * enc_t, axis=1)        # (B_pad, L_pad)

    # mask padded batch rows so the (batch-dim!) softmax of real rows is unchanged
    row = lax.broadcasted_iota(jnp.int32, (B_pad, L_pad), 0)
    energies = jnp.where(row < batch, energies, -1e30)

    # softmax over dim=0 (the batch dim), faithfully reproducing the reference quirk
    m = jnp.max(energies, axis=0, keepdims=True)
    e = jnp.exp(energies - m)
    attn_w = e / jnp.sum(e, axis=0, keepdims=True)                # exact normalization

    # context = attn_w bmm enc (pad L columns of enc_t are zero -> contribute nothing)
    context = jnp.sum(attn_w[:, None, :] * enc_t, axis=2)         # (B_pad, H)

    # ---- concat-free Linear(2H->H) + tanh: split weight, two matmuls summed ----
    concat_out = jnp.tanh(
        jnp.dot(h_new, w_cat_a_ref[...], preferred_element_type=jnp.float32)
        + jnp.dot(context, w_cat_b_ref[...], preferred_element_type=jnp.float32)
        + b_cat_ref[...])                                         # (B_pad, H)

    # ---- output projection (weights pre-padded so V is lane-dense) ----
    logits = (jnp.dot(concat_out, w_out_ref[...], preferred_element_type=jnp.float32)
              + b_out_ref[...])                                   # (B_pad, V_pad)

    out_ref[0] = logits
    attn_ref[0] = attn_w
    h_out_ref[...] = h_new         # resident output block; final value written once


# ----------------------------------------------------------------------------------
# Parameters (PyTorch layout) and one-time kernel-ready preparation.
# ----------------------------------------------------------------------------------
def init_params(key, hidden_size, output_size):
    ks = jax.random.split(key, 9)
    s = 0.1
    return {
        "embedding": jax.random.normal(ks[0], (output_size, hidden_size), jnp.float32) * s,
        "w_ih": jax.random.normal(ks[1], (3 * hidden_size, hidden_size), jnp.float32) * s,
        "w_hh": jax.random.normal(ks[2], (3 * hidden_size, hidden_size), jnp.float32) * s,
        "b_ih": jax.random.normal(ks[3], (3 * hidden_size,), jnp.float32) * s,
        "b_hh": jax.random.normal(ks[4], (3 * hidden_size,), jnp.float32) * s,
        "w_cat": jax.random.normal(ks[5], (hidden_size, 2 * hidden_size), jnp.float32) * s,
        "b_cat": jax.random.normal(ks[6], (hidden_size,), jnp.float32) * s,
        "w_out": jax.random.normal(ks[7], (output_size, hidden_size), jnp.float32) * s,
        "b_out": jax.random.normal(ks[8], (output_size,), jnp.float32) * s,
    }


def prepare_params(params, hidden_size, output_size):
    """One-time: fuse / transpose / pad weights so the per-step kernel does minimal work."""
    H, V = hidden_size, output_size
    G = 3 * H
    G_pad = _round_up(G, LANE)
    V_pad = _round_up(V, LANE)
    # embedding lookup fused with GRU input projection (+ b_ih folded in): (V, 3H_pad)
    gi_tab = params["embedding"] @ params["w_ih"].T + params["b_ih"][None, :]
    return {
        "gi_tab": jnp.pad(gi_tab, ((0, 0), (0, G_pad - G))),
        "w_h": jnp.pad(params["w_hh"].T, ((0, 0), (0, G_pad - G))),        # (H, 3H_pad)
        "b_hh": jnp.pad(params["b_hh"][None, :], ((0, 0), (0, G_pad - G))),
        "w_cat_a": params["w_cat"][:, :H].T,       # (H, H): rnn_output half of concat
        "w_cat_b": params["w_cat"][:, H:].T,       # (H, H): context half of concat
        "b_cat": params["b_cat"][None, :],
        "w_out": jnp.pad(params["w_out"].T, ((0, 0), (0, V_pad - V))),     # (H, V_pad)
        "b_out": jnp.pad(params["b_out"][None, :], ((0, 0), (0, V_pad - V))),
    }


def prepare_encoder_outputs(encoder_outputs):
    """Once per source sequence: (L,B,H) -> lane-dense (B_pad, H, L_pad), zero padded."""
    L, B, H = encoder_outputs.shape
    B_pad = _round_up(B, SUBLANE)
    L_pad = _round_up(L, LANE)
    enc_t = jnp.transpose(encoder_outputs, (1, 2, 0))            # (B, H, L)
    return jnp.pad(enc_t, ((0, B_pad - B), (0, 0), (0, L_pad - L)))


# ----------------------------------------------------------------------------------
# Wrappers.
# ----------------------------------------------------------------------------------
def attn_decoder_decode(token_ids, hidden, enc_prepared, kparams, *, seq_len):
    """Fused T-step (teacher-forced) decode in ONE pallas_call.
    token_ids: (T, B) int32, hidden: (1, B, H) f32, enc_prepared from
    prepare_encoder_outputs.  Returns (outputs (T,B,V), hidden (1,B,H), attn (T,B,1,L))."""
    T, B = token_ids.shape
    H = hidden.shape[-1]
    B_pad, _, L_pad = enc_prepared.shape
    V = kparams["gi_tab"].shape[0]
    G_pad = kparams["gi_tab"].shape[1]
    V_pad = kparams["w_out"].shape[1]

    ids = jnp.pad(token_ids.astype(jnp.int32), ((0, 0), (0, B_pad - B)))
    h0 = jnp.pad(hidden[0], ((0, B_pad - B), (0, 0)))            # (B_pad, H)

    const2 = lambda t, ids: (0, 0)        # weights: same block every step -> DMA'd once
    const3 = lambda t, ids: (0, 0, 0)

    grid_spec = pltpu.PrefetchScalarGridSpec(
        num_scalar_prefetch=1,
        grid=(T,),
        in_specs=[
            pl.BlockSpec((B_pad, H), const2),              # h0
            pl.BlockSpec((B_pad, H, L_pad), const3),       # enc_t
            pl.BlockSpec((V, G_pad), const2),              # gi_tab (emb fused w/ W_ih, b_ih)
            pl.BlockSpec((H, G_pad), const2),              # fused hidden-gate weight
            pl.BlockSpec((1, G_pad), const2),              # b_hh
            pl.BlockSpec((H, H), const2),                  # w_cat_a
            pl.BlockSpec((H, H), const2),                  # w_cat_b
            pl.BlockSpec((1, H), const2),                  # b_cat
            pl.BlockSpec((H, V_pad), const2),              # w_out
            pl.BlockSpec((1, V_pad), const2),              # b_out
        ],
        out_specs=[
            pl.BlockSpec((1, B_pad, V_pad), lambda t, ids: (t, 0, 0)),   # logits per step
            pl.BlockSpec((B_pad, H), const2),                            # final hidden
            pl.BlockSpec((1, B_pad, L_pad), lambda t, ids: (t, 0, 0)),   # attn per step
        ],
        scratch_shapes=[
            pltpu.VMEM((B_pad, H), jnp.float32),           # hidden carried across steps
            pltpu.VMEM((B_pad, G_pad), jnp.float32),       # gathered gi rows
        ],
    )

    kernel = functools.partial(attn_decoder_kernel, batch=B)

    logits_p, h_p, attn_p = pl.pallas_call(
        kernel,
        grid_spec=grid_spec,
        out_shape=(
            jax.ShapeDtypeStruct((T, B_pad, V_pad), jnp.float32),
            jax.ShapeDtypeStruct((B_pad, H), jnp.float32),
            jax.ShapeDtypeStruct((T, B_pad, L_pad), jnp.float32),
        ),
        compiler_params=pltpu.CompilerParams(
            dimension_semantics=("arbitrary",)),           # sequential: hidden carry
    )(ids, h0, enc_prepared, kparams["gi_tab"], kparams["w_h"], kparams["b_hh"],
      kparams["w_cat_a"], kparams["w_cat_b"], kparams["b_cat"],
      kparams["w_out"], kparams["b_out"])

    outputs = logits_p[:, :B, :V]                          # (T, B, V)
    hidden_new = h_p[:B, :].reshape(1, B, H)               # (1, B, H)
    attn_weights = attn_p[:, :B, None, :seq_len]           # (T, B, 1, L)
    return outputs, hidden_new, attn_weights


def attn_decoder_forward(input_ids, hidden, enc_prepared, kparams, *, seq_len):
    """Single step == the PyTorch module's forward(): (B,V), (1,B,H), (B,1,L)."""
    outs, h_new, attns = attn_decoder_decode(
        input_ids[None, :], hidden, enc_prepared, kparams, seq_len=seq_len)
    return outs[0], h_new, attns[0]


# ----------------------------------------------------------------------------------
# Pure-JAX reference (mirrors the PyTorch module) for numerical sanity checks.
# ----------------------------------------------------------------------------------
def reference_forward(input_ids, hidden, encoder_outputs, params):
    H = hidden.shape[-1]
    emb = params["embedding"][input_ids]                   # (B, H)
    h = hidden[0]
    gi = emb @ params["w_ih"].T + params["b_ih"]
    gh = h @ params["w_hh"].T + params["b_hh"]
    r = jax.nn.sigmoid(gi[:, :H] + gh[:, :H])
    z = jax.nn.sigmoid(gi[:, H:2 * H] + gh[:, H:2 * H])
    n = jnp.tanh(gi[:, 2 * H:] + r * gh[:, 2 * H:])
    h_new = (1.0 - z) * n + z * h
    enc = jnp.transpose(encoder_outputs, (1, 0, 2))        # (B, L, H)
    energies = jnp.einsum('blh,bh->bl', enc, h_new)
    attn = jax.nn.softmax(energies, axis=0)                # softmax over batch (quirk)
    context = jnp.einsum('bl,blh->bh', attn, enc)
    concat = jnp.concatenate([h_new, context], axis=1)
    co = jnp.tanh(concat @ params["w_cat"].T + params["b_cat"])
    out = co @ params["w_out"].T + params["b_out"]
    return out, h_new[None], attn[:, None, :]


def reference_decode(token_ids, hidden, encoder_outputs, params):
    outs, attns = [], []
    h = hidden
    for t in range(token_ids.shape[0]):
        o, h, a = reference_forward(token_ids[t], h, encoder_outputs, params)
        outs.append(o)
        attns.append(a)
    return jnp.stack(outs), h, jnp.stack(attns)


if __name__ == "__main__":
    hidden_size = 32
    output_size = 64   # vocab
    batch = 2
    seq_len = 8        # <= MAX_LENGTH
    T = 4              # decode steps for the fused multi-step path

    key = jax.random.PRNGKey(0)
    k_par, k_in, k_h, k_enc, k_tok = jax.random.split(key, 5)

    params = init_params(k_par, hidden_size, output_size)
    kparams = prepare_params(params, hidden_size, output_size)      # once, not per step

    input_ids = jax.random.randint(k_in, (batch,), 0, output_size, dtype=jnp.int32)
    hidden = jax.random.normal(k_h, (1, batch, hidden_size), jnp.float32)
    encoder_outputs = jax.random.normal(k_enc, (seq_len, batch, hidden_size), jnp.float32)
    token_seq = jax.random.randint(k_tok, (T, batch), 0, output_size, dtype=jnp.int32)

    enc_prepared = prepare_encoder_outputs(encoder_outputs)         # once per source seq

    # --- single step (== module.forward) ---
    step_fn = jax.jit(attn_decoder_forward, static_argnames=("seq_len",))
    output, hidden_new, attn_weights = step_fn(
        input_ids, hidden, enc_prepared, kparams, seq_len=seq_len)
    jax.block_until_ready((output, hidden_new, attn_weights))

    assert output.shape == (batch, output_size)
    assert hidden_new.shape == (1, batch, hidden_size)
    assert attn_weights.shape == (batch, 1, seq_len)

    ref_out, ref_h, ref_attn = reference_forward(input_ids, hidden, encoder_outputs, params)
    assert jnp.allclose(output, ref_out, atol=1e-3, rtol=1e-3)
    assert jnp.allclose(hidden_new, ref_h, atol=1e-3, rtol=1e-3)
    assert jnp.allclose(attn_weights, ref_attn, atol=1e-3, rtol=1e-3)

    # --- fused multi-step decode (one pallas_call for T steps) ---
    decode_fn = jax.jit(attn_decoder_decode, static_argnames=("seq_len",))
    outs, h_T, attns = decode_fn(token_seq, hidden, enc_prepared, kparams, seq_len=seq_len)
    jax.block_until_ready((outs, h_T, attns))

    assert outs.shape == (T, batch, output_size)
    assert h_T.shape == (1, batch, hidden_size)
    assert attns.shape == (T, batch, 1, seq_len)

    ref_outs, ref_hT, ref_attns = reference_decode(token_seq, hidden, encoder_outputs, params)
    assert jnp.allclose(outs, ref_outs, atol=1e-3, rtol=1e-3)
    assert jnp.allclose(h_T, ref_hT, atol=1e-3, rtol=1e-3)
    assert jnp.allclose(attns, ref_attns, atol=1e-3, rtol=1e-3)

    print("KERNEL_OK")
</pallas_src>

<mosaic_0001>
module attributes {stable_mosaic.version = 11 : i64} {
  func.func @attn_decoder_kernel(%arg0: i32, %arg1: memref<1x8xi32, #tpu.memory_space<smem>>, %arg2: memref<8x32xf32, #tpu.memory_space<vmem>>, %arg3: memref<8x32x128xf32, #tpu.memory_space<vmem>>, %arg4: memref<64x128xf32, #tpu.memory_space<vmem>>, %arg5: memref<32x128xf32, #tpu.memory_space<vmem>>, %arg6: memref<1x128xf32, #tpu.memory_space<vmem>>, %arg7: memref<32x32xf32, #tpu.memory_space<vmem>>, %arg8: memref<32x32xf32, #tpu.memory_space<vmem>>, %arg9: memref<1x32xf32, #tpu.memory_space<vmem>>, %arg10: memref<32x128xf32, #tpu.memory_space<vmem>>, %arg11: memref<1x128xf32, #tpu.memory_space<vmem>>, %arg12: memref<1x8x128xf32, #tpu.memory_space<vmem>>, %arg13: memref<8x32xf32, #tpu.memory_space<vmem>>, %arg14: memref<1x8x128xf32, #tpu.memory_space<vmem>>, %arg15: memref<8x32xf32, #tpu.memory_space<vmem>>, %arg16: memref<8x128xf32, #tpu.memory_space<vmem>>) attributes {dimension_semantics = [#tpu.dimension_semantics<arbitrary>], iteration_bounds = array<i64: 1>, scalar_prefetch = 1 : i64, scratch_operands = 2 : i64, tpu.core_type = #tpu.core_type<tc>, window_params = [{pipeline_mode = #tpu.pipeline_mode<synchronous>, transform_indices = @transform_0, window_bounds = array<i64: 8, 32>}, {pipeline_mode = #tpu.pipeline_mode<synchronous>, transform_indices = @transform_1, window_bounds = array<i64: 8, 32, 128>}, {pipeline_mode = #tpu.pipeline_mode<synchronous>, transform_indices = @transform_2, window_bounds = array<i64: 64, 128>}, {pipeline_mode = #tpu.pipeline_mode<synchronous>, transform_indices = @transform_3, window_bounds = array<i64: 32, 128>}, {pipeline_mode = #tpu.pipeline_mode<synchronous>, transform_indices = @transform_4, window_bounds = array<i64: 1, 128>}, {pipeline_mode = #tpu.pipeline_mode<synchronous>, transform_indices = @transform_5, window_bounds = array<i64: 32, 32>}, {pipeline_mode = #tpu.pipeline_mode<synchronous>, transform_indices = @transform_6, window_bounds = array<i64: 32, 32>}, {pipeline_mode = #tpu.pipeline_mode<synchronous>, transform_indices = @transform_7, window_bounds = array<i64: 1, 32>}, {pipeline_mode = #tpu.pipeline_mode<synchronous>, transform_indices = @transform_8, window_bounds = array<i64: 32, 128>}, {pipeline_mode = #tpu.pipeline_mode<synchronous>, transform_indices = @transform_9, window_bounds = array<i64: 1, 128>}, {transform_indices = @transform_10, window_bounds = array<i64: 1, 8, 128>}, {pipeline_mode = #tpu.pipeline_mode<synchronous>, transform_indices = @transform_11, window_bounds = array<i64: 8, 32>}, {transform_indices = @transform_12, window_bounds = array<i64: 1, 8, 128>}]} {
    %c0_i32 = arith.constant 0 : i32
    %0 = arith.cmpi eq, %arg0, %c0_i32 : i32
    %1 = arith.extui %0 : i1 to i32
    %c0_i32_0 = arith.constant 0 : i32
    %2 = arith.cmpi ne, %1, %c0_i32_0 : i32
    scf.if %2 {
      %c0_66 = arith.constant 0 : index
      %c0_67 = arith.constant 0 : index
      %115 = vector.load %arg2[%c0_66, %c0_67] : memref<8x32xf32, #tpu.memory_space<vmem>>, vector<8x32xf32>
      %c0_68 = arith.constant 0 : index
      %c0_69 = arith.constant 0 : index
      %116 = vector.load %arg15[%c0_68, %c0_69] : memref<8x32xf32, #tpu.memory_space<vmem>>, vector<8x32xf32>
      tpu.vector_store %arg15[%c0_68, %c0_69], %115 {strides = array<i32>} : memref<8x32xf32, #tpu.memory_space<vmem>>, vector<8x32xf32>,
    } else {
    }
    %3 = arith.index_cast %arg0 : i32 to index
    %c0 = arith.constant 0 : index
    %4 = memref.load %arg1[%3, %c0] : memref<1x8xi32, #tpu.memory_space<smem>>
    %5 = arith.index_cast %4 : i32 to index
    %c0_1 = arith.constant 0 : index
    %6 = vector.load %arg4[%5, %c0_1] : memref<64x128xf32, #tpu.memory_space<vmem>>, vector<1x128xf32>
    %c0_2 = arith.constant 0 : index
    %c0_3 = arith.constant 0 : index
    %7 = vector.load %arg16[%c0_2, %c0_3] : memref<8x128xf32, #tpu.memory_space<vmem>>, vector<1x128xf32>
    tpu.vector_store %arg16[%c0_2, %c0_3], %6 {strides = array<i32>} : memref<8x128xf32, #tpu.memory_space<vmem>>, vector<1x128xf32>,
    %8 = arith.index_cast %arg0 : i32 to index
    %c1 = arith.constant 1 : index
    %9 = memref.load %arg1[%8, %c1] : memref<1x8xi32, #tpu.memory_space<smem>>
    %10 = arith.index_cast %9 : i32 to index
    %c0_4 = arith.constant 0 : index
    %11 = vector.load %arg4[%10, %c0_4] : memref<64x128xf32, #tpu.memory_space<vmem>>, vector<1x128xf32>
    %c1_5 = arith.constant 1 : index
    %c0_6 = arith.constant 0 : index
    %12 = vector.load %arg16[%c1_5, %c0_6] : memref<8x128xf32, #tpu.memory_space<vmem>>, vector<1x128xf32>
    tpu.vector_store %arg16[%c1_5, %c0_6], %11 {strides = array<i32>} : memref<8x128xf32, #tpu.memory_space<vmem>>, vector<1x128xf32>,
    %13 = arith.index_cast %arg0 : i32 to index
    %c2 = arith.constant 2 : index
    %14 = memref.load %arg1[%13, %c2] : memref<1x8xi32, #tpu.memory_space<smem>>
    %15 = arith.index_cast %14 : i32 to index
    %c0_7 = arith.constant 0 : index
    %16 = vector.load %arg4[%15, %c0_7] : memref<64x128xf32, #tpu.memory_space<vmem>>, vector<1x128xf32>
    %c2_8 = arith.constant 2 : index
    %c0_9 = arith.constant 0 : index
    %17 = vector.load %arg16[%c2_8, %c0_9] : memref<8x128xf32, #tpu.memory_space<vmem>>, vector<1x128xf32>
    tpu.vector_store %arg16[%c2_8, %c0_9], %16 {strides = array<i32>} : memref<8x128xf32, #tpu.memory_space<vmem>>, vector<1x128xf32>,
    %18 = arith.index_cast %arg0 : i32 to index
    %c3 = arith.constant 3 : index
    %19 = memref.load %arg1[%18, %c3] : memref<1x8xi32, #tpu.memory_space<smem>>
    %20 = arith.index_cast %19 : i32 to index
    %c0_10 = arith.constant 0 : index
    %21 = vector.load %arg4[%20, %c0_10] : memref<64x128xf32, #tpu.memory_space<vmem>>, vector<1x128xf32>
    %c3_11 = arith.constant 3 : index
    %c0_12 = arith.constant 0 : index
    %22 = vector.load %arg16[%c3_11, %c0_12] : memref<8x128xf32, #tpu.memory_space<vmem>>, vector<1x128xf32>
    tpu.vector_store %arg16[%c3_11, %c0_12], %21 {strides = array<i32>} : memref<8x128xf32, #tpu.memory_space<vmem>>, vector<1x128xf32>,
    %23 = arith.index_cast %arg0 : i32 to index
    %c4 = arith.constant 4 : index
    %24 = memref.load %arg1[%23, %c4] : memref<1x8xi32, #tpu.memory_space<smem>>
    %25 = arith.index_cast %24 : i32 to index
    %c0_13 = arith.constant 0 : index
    %26 = vector.load %arg4[%25, %c0_13] : memref<64x128xf32, #tpu.memory_space<vmem>>, vector<1x128xf32>
    %c4_14 = arith.constant 4 : index
    %c0_15 = arith.constant 0 : index
    %27 = vector.load %arg16[%c4_14, %c0_15] : memref<8x128xf32, #tpu.memory_space<vmem>>, vector<1x128xf32>
    tpu.vector_store %arg16[%c4_14, %c0_15], %26 {strides = array<i32>} : memref<8x128xf32, #tpu.memory_space<vmem>>, vector<1x128xf32>,
    %28 = arith.index_cast %arg0 : i32 to index
    %c5 = arith.constant 5 : index
    %29 = memref.load %arg1[%28, %c5] : memref<1x8xi32, #tpu.memory_space<smem>>
    %30 = arith.index_cast %29 : i32 to index
    %c0_16 = arith.constant 0 : index
    %31 = vector.load %arg4[%30, %c0_16] : memref<64x128xf32, #tpu.memory_space<vmem>>, vector<1x128xf32>
    %c5_17 = arith.constant 5 : index
    %c0_18 = arith.constant 0 : index
    %32 = vector.load %arg16[%c5_17, %c0_18] : memref<8x128xf32, #tpu.memory_space<vmem>>, vector<1x128xf32>
    tpu.vector_store %arg16[%c5_17, %c0_18], %31 {strides = array<i32>} : memref<8x128xf32, #tpu.memory_space<vmem>>, vector<1x128xf32>,
    %33 = arith.index_cast %arg0 : i32 to index
    %c6 = arith.constant 6 : index
    %34 = memref.load %arg1[%33, %c6] : memref<1x8xi32, #tpu.memory_space<smem>>
    %35 = arith.index_cast %34 : i32 to index
    %c0_19 = arith.constant 0 : index
    %36 = vector.load %arg4[%35, %c0_19] : memref<64x128xf32, #tpu.memory_space<vmem>>, vector<1x128xf32>
    %c6_20 = arith.constant 6 : index
    %c0_21 = arith.constant 0 : index
    %37 = vector.load %arg16[%c6_20, %c0_21] : memref<8x128xf32, #tpu.memory_space<vmem>>, vector<1x128xf32>
    tpu.vector_store %arg16[%c6_20, %c0_21], %36 {strides = array<i32>} : memref<8x128xf32, #tpu.memory_space<vmem>>, vector<1x128xf32>,
    %38 = arith.index_cast %arg0 : i32 to index
    %c7 = arith.constant 7 : index
    %39 = memref.load %arg1[%38, %c7] : memref<1x8xi32, #tpu.memory_space<smem>>
    %40 = arith.index_cast %39 : i32 to index
    %c0_22 = arith.constant 0 : index
    %41 = vector.load %arg4[%40, %c0_22] : memref<64x128xf32, #tpu.memory_space<vmem>>, vector<1x128xf32>
    %c7_23 = arith.constant 7 : index
    %c0_24 = arith.constant 0 : index
    %42 = vector.load %arg16[%c7_23, %c0_24] : memref<8x128xf32, #tpu.memory_space<vmem>>, vector<1x128xf32>
    tpu.vector_store %arg16[%c7_23, %c0_24], %41 {strides = array<i32>} : memref<8x128xf32, #tpu.memory_space<vmem>>, vector<1x128xf32>,
    %c0_25 = arith.constant 0 : index
    %c0_26 = arith.constant 0 : index
    %43 = vector.load %arg16[%c0_25, %c0_26] : memref<8x128xf32, #tpu.memory_space<vmem>>, vector<8x128xf32>
    %c0_27 = arith.constant 0 : index
    %c0_28 = arith.constant 0 : index
    %44 = vector.load %arg15[%c0_27, %c0_28] : memref<8x32xf32, #tpu.memory_space<vmem>>, vector<8x32xf32>
    %c0_29 = arith.constant 0 : index
    %c0_30 = arith.constant 0 : index
    %45 = vector.load %arg5[%c0_29, %c0_30] : memref<32x128xf32, #tpu.memory_space<vmem>>, vector<32x128xf32>
    %cst = arith.constant dense<0.000000e+00> : vector<8x128xf32>
    %46 = tpu.matmul %44, %45, %cst {dimension_numbers = #tpu.dot_dimension_numbers<[1], [0], [0], [1], [0, 0, 1, 1], [], []>} : vector<8x32xf32>, vector<32x128xf32>, vector<8x128xf32> -> vector<8x128xf32>
    %c0_31 = arith.constant 0 : index
    %c0_32 = arith.constant 0 : index
    %47 = vector.load %arg6[%c0_31, %c0_32] : memref<1x128xf32, #tpu.memory_space<vmem>>, vector<1x128xf32>
    %48 = vector.broadcast %47 : vector<1x128xf32> to vector<8x128xf32>
    %49 = arith.addf %46, %48 : vector<8x128xf32>
    %50 = vector.extract_strided_slice %43 {offsets = [0, 0], sizes = [8, 64], strides = [1, 1]} : vector<8x128xf32> to vector<8x64xf32>
    %51 = vector.extract_strided_slice %49 {offsets = [0, 0], sizes = [8, 64], strides = [1, 1]} : vector<8x128xf32> to vector<8x64xf32>
    %52 = arith.addf %50, %51 : vector<8x64xf32>
    %53 = arith.negf %52 : vector<8x64xf32>
    %54 = math.exp %53 : vector<8x64xf32>
    %cst_33 = arith.constant 1.000000e+00 : f32
    %55 = vector.broadcast %cst_33 : f32 to vector<8x64xf32>
    %56 = arith.addf %55, %54 : vector<8x64xf32>
    %57 = arith.divf %55, %56 : vector<8x64xf32>
    %58 = vector.extract_strided_slice %57 {offsets = [0, 0], sizes = [8, 32], strides = [1, 1]} : vector<8x64xf32> to vector<8x32xf32>
    %59 = vector.extract_strided_slice %57 {offsets = [0, 32], sizes = [8, 32], strides = [1, 1]} : vector<8x64xf32> to vector<8x32xf32>
    %60 = vector.extract_strided_slice %43 {offsets = [0, 64], sizes = [8, 32], strides = [1, 1]} : vector<8x128xf32> to vector<8x32xf32>
    %61 = vector.extract_strided_slice %49 {offsets = [0, 64], sizes = [8, 32], strides = [1, 1]} : vector<8x128xf32> to vector<8x32xf32>
    %62 = arith.mulf %58, %61 : vector<8x32xf32>
    %63 = arith.addf %60, %62 : vector<8x32xf32>
    %64 = math.tanh %63 : vector<8x32xf32>
    %cst_34 = arith.constant 1.000000e+00 : f32
    %65 = vector.broadcast %cst_34 : f32 to vector<8x32xf32>
    %66 = arith.subf %65, %59 : vector<8x32xf32>
    %67 = arith.mulf %66, %64 : vector<8x32xf32>
    %68 = arith.mulf %59, %44 : vector<8x32xf32>
    %69 = arith.addf %67, %68 : vector<8x32xf32>
    %c0_35 = arith.constant 0 : index
    %c0_36 = arith.constant 0 : index
    %70 = vector.load %arg15[%c0_35, %c0_36] : memref<8x32xf32, #tpu.memory_space<vmem>>, vector<8x32xf32>
    tpu.vector_store %arg15[%c0_35, %c0_36], %69 {strides = array<i32>} : memref<8x32xf32, #tpu.memory_space<vmem>>, vector<8x32xf32>,
    %c0_37 = arith.constant 0 : index
    %c0_38 = arith.constant 0 : index
    %c0_39 = arith.constant 0 : index
    %71 = vector.load %arg3[%c0_37, %c0_38, %c0_39] : memref<8x32x128xf32, #tpu.memory_space<vmem>>, vector<8x32x128xf32>
    %72 = vector.shape_cast %69 : vector<8x32xf32> to vector<8x32x1xf32>
    %73 = vector.broadcast %72 : vector<8x32x1xf32> to vector<8x32x128xf32>
    %74 = arith.mulf %73, %71 : vector<8x32x128xf32>
    %cst_40 = arith.constant dense<0.000000e+00> : vector<8x128xf32>
    %75 = vector.multi_reduction <add>, %74, %cst_40 [1] : vector<8x32x128xf32> to vector<8x128xf32>
    %76 = tpu.iota {dimensions = array<i32: 0>} : vector<8x128xi32>
    %c2_i32 = arith.constant 2 : i32
    %77 = vector.broadcast %c2_i32 : i32 to vector<8x128xi32>
    %78 = arith.cmpi slt, %76, %77 : vector<8x128xi32>
    %cst_41 = arith.constant -1.000000e+30 : f32
    %79 = vector.broadcast %cst_41 : f32 to vector<8x128xf32>
    %80 = arith.select %78, %75, %79 : vector<8x128xi1>, vector<8x128xf32>
    %cst_42 = arith.constant dense<0xFF800000> : vector<128xf32>
    %81 = vector.multi_reduction <maximumf>, %80, %cst_42 [0] : vector<8x128xf32> to vector<128xf32>
    %82 = vector.shape_cast %81 : vector<128xf32> to vector<1x128xf32>
    %83 = vector.broadcast %82 : vector<1x128xf32> to vector<8x128xf32>
    %84 = arith.subf %80, %83 : vector<8x128xf32>
    %85 = math.exp %84 : vector<8x128xf32>
    %cst_43 = arith.constant dense<0.000000e+00> : vector<128xf32>
    %86 = vector.multi_reduction <add>, %85, %cst_43 [0] : vector<8x128xf32> to vector<128xf32>
    %87 = vector.shape_cast %86 : vector<128xf32> to vector<1x128xf32>
    %88 = vector.broadcast %87 : vector<1x128xf32> to vector<8x128xf32>
    %89 = arith.divf %85, %88 : vector<8x128xf32>
    %90 = vector.shape_cast %89 : vector<8x128xf32> to vector<8x1x128xf32>
    %91 = vector.broadcast %90 : vector<8x1x128xf32> to vector<8x32x128xf32>
    %92 = arith.mulf %91, %71 : vector<8x32x128xf32>
    %cst_44 = arith.constant dense<0.000000e+00> : vector<8x32xf32>
    %93 = vector.multi_reduction <add>, %92, %cst_44 [2] : vector<8x32x128xf32> to vector<8x32xf32>
    %c0_45 = arith.constant 0 : index
    %c0_46 = arith.constant 0 : index
    %94 = vector.load %arg7[%c0_45, %c0_46] : memref<32x32xf32, #tpu.memory_space<vmem>>, vector<32x32xf32>
    %cst_47 = arith.constant dense<0.000000e+00> : vector<8x32xf32>
    %95 = tpu.matmul %69, %94, %cst_47 {dimension_numbers = #tpu.dot_dimension_numbers<[1], [0], [0], [1], [0, 0, 1, 1], [], []>} : vector<8x32xf32>, vector<32x32xf32>, vector<8x32xf32> -> vector<8x32xf32>
    %c0_48 = arith.constant 0 : index
    %c0_49 = arith.constant 0 : index
    %96 = vector.load %arg8[%c0_48, %c0_49] : memref<32x32xf32, #tpu.memory_space<vmem>>, vector<32x32xf32>
    %cst_50 = arith.constant dense<0.000000e+00> : vector<8x32xf32>
    %97 = tpu.matmul %93, %96, %cst_50 {dimension_numbers = #tpu.dot_dimension_numbers<[1], [0], [0], [1], [0, 0, 1, 1], [], []>} : vector<8x32xf32>, vector<32x32xf32>, vector<8x32xf32> -> vector<8x32xf32>
    %98 = arith.addf %95, %97 : vector<8x32xf32>
    %c0_51 = arith.constant 0 : index
    %c0_52 = arith.constant 0 : index
    %99 = vector.load %arg9[%c0_51, %c0_52] : memref<1x32xf32, #tpu.memory_space<vmem>>, vector<1x32xf32>
    %100 = vector.broadcast %99 : vector<1x32xf32> to vector<8x32xf32>
    %101 = arith.addf %98, %100 : vector<8x32xf32>
    %102 = math.tanh %101 : vector<8x32xf32>
    %c0_53 = arith.constant 0 : index
    %c0_54 = arith.constant 0 : index
    %103 = vector.load %arg10[%c0_53, %c0_54] : memref<32x128xf32, #tpu.memory_space<vmem>>, vector<32x128xf32>
    %cst_55 = arith.constant dense<0.000000e+00> : vector<8x128xf32>
    %104 = tpu.matmul %102, %103, %cst_55 {dimension_numbers = #tpu.dot_dimension_numbers<[1], [0], [0], [1], [0, 0, 1, 1], [], []>} : vector<8x32xf32>, vector<32x128xf32>, vector<8x128xf32> -> vector<8x128xf32>
    %c0_56 = arith.constant 0 : index
    %c0_57 = arith.constant 0 : index
    %105 = vector.load %arg11[%c0_56, %c0_57] : memref<1x128xf32, #tpu.memory_space<vmem>>, vector<1x128xf32>
    %106 = vector.broadcast %105 : vector<1x128xf32> to vector<8x128xf32>
    %107 = arith.addf %104, %106 : vector<8x128xf32>
    %c0_58 = arith.constant 0 : index
    %c0_59 = arith.constant 0 : index
    %c0_60 = arith.constant 0 : index
    %108 = vector.load %arg12[%c0_58, %c0_59, %c0_60] : memref<1x8x128xf32, #tpu.memory_space<vmem>>, vector<1x8x128xf32>
    %109 = vector.shape_cast %108 : vector<1x8x128xf32> to vector<8x128xf32>
    %110 = vector.shape_cast %107 : vector<8x128xf32> to vector<1x8x128xf32>
    tpu.vector_store %arg12[%c0_58, %c0_59, %c0_60], %110 {strides = array<i32>} : memref<1x8x128xf32, #tpu.memory_space<vmem>>, vector<1x8x128xf32>,
    %c0_61 = arith.constant 0 : index
    %c0_62 = arith.constant 0 : index
    %c0_63 = arith.constant 0 : index
    %111 = vector.load %arg14[%c0_61, %c0_62, %c0_63] : memref<1x8x128xf32, #tpu.memory_space<vmem>>, vector<1x8x128xf32>
    %112 = vector.shape_cast %111 : vector<1x8x128xf32> to vector<8x128xf32>
    %113 = vector.shape_cast %89 : vector<8x128xf32> to vector<1x8x128xf32>
    tpu.vector_store %arg14[%c0_61, %c0_62, %c0_63], %113 {strides = array<i32>} : memref<1x8x128xf32, #tpu.memory_space<vmem>>, vector<1x8x128xf32>,
    %c0_64 = arith.constant 0 : index
    %c0_65 = arith.constant 0 : index
    %114 = vector.load %arg13[%c0_64, %c0_65] : memref<8x32xf32, #tpu.memory_space<vmem>>, vector<8x32xf32>
    tpu.vector_store %arg13[%c0_64, %c0_65], %69 {strides = array<i32>} : memref<8x32xf32, #tpu.memory_space<vmem>>, vector<8x32xf32>,
    return
  }
  func.func @transform_0(%arg0: i32, %arg1: memref<1x8xi32, #tpu.memory_space<smem>>) -> (i32, i32) {
    %c0_i32 = arith.constant 0 : i32
    %c0_i32_0 = arith.constant 0 : i32
    %c0_i32_1 = arith.constant 0 : i32
    return %c0_i32, %c0_i32_0 : i32, i32
  }
  func.func @transform_1(%arg0: i32, %arg1: memref<1x8xi32, #tpu.memory_space<smem>>) -> (i32, i32, i32) {
    %c0_i32 = arith.constant 0 : i32
    %c0_i32_0 = arith.constant 0 : i32
    %c0_i32_1 = arith.constant 0 : i32
    %c0_i32_2 = arith.constant 0 : i32
    return %c0_i32, %c0_i32_0, %c0_i32_1 : i32, i32, i32
  }
  func.func @transform_2(%arg0: i32, %arg1: memref<1x8xi32, #tpu.memory_space<smem>>) -> (i32, i32) {
    %c0_i32 = arith.constant 0 : i32
    %c0_i32_0 = arith.constant 0 : i32
    %c0_i32_1 = arith.constant 0 : i32
    return %c0_i32, %c0_i32_0 : i32, i32
  }
  func.func @transform_3(%arg0: i32, %arg1: memref<1x8xi32, #tpu.memory_space<smem>>) -> (i32, i32) {
    %c0_i32 = arith.constant 0 : i32
    %c0_i32_0 = arith.constant 0 : i32
    %c0_i32_1 = arith.constant 0 : i32
    return %c0_i32, %c0_i32_0 : i32, i32
  }
  func.func @transform_4(%arg0: i32, %arg1: memref<1x8xi32, #tpu.memory_space<smem>>) -> (i32, i32) {
    %c0_i32 = arith.constant 0 : i32
    %c0_i32_0 = arith.constant 0 : i32
    %c0_i32_1 = arith.constant 0 : i32
    return %c0_i32, %c0_i32_0 : i32, i32
  }
  func.func @transform_5(%arg0: i32, %arg1: memref<1x8xi32, #tpu.memory_space<smem>>) -> (i32, i32) {
    %c0_i32 = arith.constant 0 : i32
    %c0_i32_0 = arith.constant 0 : i32
    %c0_i32_1 = arith.constant 0 : i32
    return %c0_i32, %c0_i32_0 : i32, i32
  }
  func.func @transform_6(%arg0: i32, %arg1: memref<1x8xi32, #tpu.memory_space<smem>>) -> (i32, i32) {
    %c0_i32 = arith.constant 0 : i32
    %c0_i32_0 = arith.constant 0 : i32
    %c0_i32_1 = arith.constant 0 : i32
    return %c0_i32, %c0_i32_0 : i32, i32
  }
  func.func @transform_7(%arg0: i32, %arg1: memref<1x8xi32, #tpu.memory_space<smem>>) -> (i32, i32) {
    %c0_i32 = arith.constant 0 : i32
    %c0_i32_0 = arith.constant 0 : i32
    %c0_i32_1 = arith.constant 0 : i32
    return %c0_i32, %c0_i32_0 : i32, i32
  }
  func.func @transform_8(%arg0: i32, %arg1: memref<1x8xi32, #tpu.memory_space<smem>>) -> (i32, i32) {
    %c0_i32 = arith.constant 0 : i32
    %c0_i32_0 = arith.constant 0 : i32
    %c0_i32_1 = arith.constant 0 : i32
    return %c0_i32, %c0_i32_0 : i32, i32
  }
  func.func @transform_9(%arg0: i32, %arg1: memref<1x8xi32, #tpu.memory_space<smem>>) -> (i32, i32) {
    %c0_i32 = arith.constant 0 : i32
    %c0_i32_0 = arith.constant 0 : i32
    %c0_i32_1 = arith.constant 0 : i32
    return %c0_i32, %c0_i32_0 : i32, i32
  }
  func.func @transform_10(%arg0: i32, %arg1: memref<1x8xi32, #tpu.memory_space<smem>>) -> (i32, i32, i32) {
    %c0_i32 = arith.constant 0 : i32
    %c0_i32_0 = arith.constant 0 : i32
    %c0_i32_1 = arith.constant 0 : i32
    return %arg0, %c0_i32, %c0_i32_0 : i32, i32, i32
  }
  func.func @transform_11(%arg0: i32, %arg1: memref<1x8xi32, #tpu.memory_space<smem>>) -> (i32, i32) {
    %c0_i32 = arith.constant 0 : i32
    %c0_i32_0 = arith.constant 0 : i32
    %c0_i32_1 = arith.constant 0 : i32
    return %c0_i32, %c0_i32_0 : i32, i32
  }
  func.func @transform_12(%arg0: i32, %arg1: memref<1x8xi32, #tpu.memory_space<smem>>) -> (i32, i32, i32) {
    %c0_i32 = arith.constant 0 : i32
    %c0_i32_0 = arith.constant 0 : i32
    %c0_i32_1 = arith.constant 0 : i32
    return %arg0, %c0_i32, %c0_i32_0 : i32, i32, i32
  }
}

</mosaic_0001>

<bundles_post_ra>
// kernel: attn_decoder_forward.1
= control target key start
LH: loop header
LB: loop body
LE: loop exit
PB: predicated region body
PF: predicated region fallthrough
CT: control target
= control target key end

     0   :  { %s2054_s0 = inlined_call_operand.vmem [shape: s32[1,8], index: 0, kind: input, shape index: {}]   ;;  %s2055_s1 = inlined_call_operand.vmem [shape: f32[8,32], index: 1, kind: input, shape index: {}]   ;;  %s2056_s2 = inlined_call_operand.hbm [shape: f32[8,32,128], index: 2, kind: input, shape index: {}]   ;;  %s2057_s3 = inlined_call_operand.hbm [shape: f32[64,128], index: 3, kind: input, shape index: {}]   ;;  %s2058_s4 = inlined_call_operand.vmem [shape: f32[32,128], index: 4, kind: input, shape index: {}]   ;;  %s2059_s5 = inlined_call_operand.vmem [shape: f32[1,128], index: 5, kind: input, shape index: {}]   ;;  %s2060_s6 = inlined_call_operand.hbm [shape: f32[32,32], index: 6, kind: input, shape index: {}]   ;;  %s2061_s7 = inlined_call_operand.hbm [shape: f32[32,32], index: 7, kind: input, shape index: {}]   ;;  %s2062_s8 = inlined_call_operand.vmem [shape: f32[1,32], index: 8, kind: input, shape index: {}]   ;;  %s2063_s9 = inlined_call_operand.hbm [shape: f32[32,128], index: 9, kind: input, shape index: {}]   ;;  %s2064_s10 = inlined_call_operand.vmem [shape: f32[1,128], index: 10, kind: input, shape index: {}]   ;;  %s2065_s11 = inlined_call_operand.vmem [shape: f32[1,8,128], index: 11, kind: output, shape index: {0}]   ;;  %s2066_s12 = inlined_call_operand.vmem [shape: f32[8,32], index: 12, kind: output, shape index: {1}]   ;;  %s2067_s13 = inlined_call_operand.vmem [shape: f32[1,8,128], index: 13, kind: output, shape index: {2}]  }
   0x1   :  { %s19_s27 = sshll.u32 %s2054_s0, 4  ;;  %s20_s27 = int_to_ptr.vmem [resolvable:$true] %s19_s27 }
   0x2   :  { %s1407_s28 = scalar_lea.vmem %s20_s27, 16  ;;  %p1412_p1 = scmp.lt.s32.totalorder %s20_s27, %s20_s27 }
   0x3   :  { %p1408_p0 = scmp.ne.s32.totalorder %s20_s27, %s1407_s28  ;;  %p1413_p2 = scmp.lt.s32.totalorder %s1407_s28, %s1407_s28 }
   0x5   :  { %p1414_p3 = por %p1413_p2, %p1412_p1 }
   0x7   :  { %p1415_p4 = pnand %p1414_p3, %p1408_p0 }
   0x9   :  { %1418 = shalt.err (!%p1415_p4)  }
   0xa   :  { %s1537_s29 = smov [#allocation5]  }
   0xb   :  { %22 = dma.vmem_to_smem %s20_s27, 16, %s1537_s29, [#allocation4] }
   0xc   :  { %1529 = dma.done.wait [#allocation4], 16 }
   0xd   :  { %1530 = vsyncadd [#allocation4], 4294967280 }
   0xe   :  { %24 = sfence }
   0xf   :  { %25 = vsyncpa [#allocation7], 0 }
  0x10   :  { %26 = vsyncpa [#allocation9], 0 }
  0x11   :  { %27 = vsyncpa [#allocation12], 0  ;;  %s1538_s30 = smov [#allocation8]   ;;  %s1539_s15 = smov [#allocation11]  }
  0x12   :  { %s47_s14 = sshll.u32 %s1538_s30, 4  ;;  %s75_s0 = sshll.u32 %s1539_s15, 4  ;;  %s48_s14 = int_to_ptr.vmem [resolvable:$true] %s47_s14  ;;  %s1625_s0 = int_to_ptr.vmem [resolvable:$true] %s75_s0 }
  0x13   :  { %s1419_s18 = scalar_lea.hbm %s2057_s3, 1024 }
  0x14   :  { %p1420_p5 = scmp.ne.s32.totalorder %s2057_s3, %s1419_s18  ;;  %p1423_p6 = scmp.lt.u32.totalorder %s1419_s18, %s2057_s3 }
  0x16   :  { %p1425_p7 = pnand %p1423_p6, %p1420_p5 }
  0x18   :  { %1428 = shalt.err (!%p1425_p7)
}
  0x19   :  { %s1429_s23 = scalar_lea.vmem %s48_s14, 1024  ;;  %p1434_p9 = scmp.lt.s32.totalorder %s48_s14, %s48_s14 }
  0x1a   :  { %p1430_p8 = scmp.ne.s32.totalorder %s48_s14, %s1429_s23  ;;  %p1435_p10 = scmp.lt.s32.totalorder %s1429_s23, %s1429_s23 }
  0x1c   :  { %p1436_p11 = por %p1435_p10, %p1434_p9 }
  0x1e   :  { %p1437_p12 = pnand %p1436_p11, %p1430_p8 }
  0x20   :  { %1440 = shalt.err (!%p1437_p12)
}
  0x21   :  { %s1540_s24 = smov 128   ;;  %s1541_s25 = smov 8  }
  0x22   :  { %53 = dma.hbm_to_vmem [thread:$0]  %s2057_s3, 1024, %s48_s14, [#allocation9], %s1540_s24, %s1540_s24, %s1541_s25  }
  0x23   :  { %s1441_s30 = scalar_lea.hbm %s2061_s7, 512 }
  0x24   :  { %p1442_p13 = scmp.ne.s32.totalorder %s2061_s7, %s1441_s30  ;;  %p1445_p0 = scmp.lt.u32.totalorder %s1441_s30, %s2061_s7 }
  0x26   :  { %p1447_p1 = pnand %p1445_p0, %p1442_p13 }
  0x28   :  { %1450 = shalt.err (!%p1447_p1)
}
  0x29   :  { %s1451_s19 = scalar_lea.vmem %s1625_s0, 512  ;;  %p1456_p3 = scmp.lt.s32.totalorder %s1625_s0, %s1625_s0 }
  0x2a   :  { %p1452_p2 = scmp.ne.s32.totalorder %s1625_s0, %s1451_s19  ;;  %p1457_p4 = scmp.lt.s32.totalorder %s1451_s19, %s1451_s19 }
  0x2c   :  { %p1458_p5 = por %p1457_p4, %p1456_p3 }
  0x2e   :  { %p1459_p6 = pnand %p1458_p5, %p1452_p2 }
  0x30   :  { %1462 = shalt.err (!%p1459_p6)
}
  0x31   :  { %81 = dma.hbm_to_vmem [thread:$0]  %s2061_s7, 512, %s1625_s0, [#allocation12], %s1540_s24, %s1540_s24, %s1541_s25  }
  0x32   :  { %s1542_s20 = smov [#allocation6]   ;;  %s1543_s22 = smov [#allocation10]  }
  0x33   :  { %s35_s21 = sshll.u32 %s1542_s20, 4  ;;  %s63_s23 = sshll.u32 %s1543_s22, 4  ;;  %s36_s21 = int_to_ptr.vmem [resolvable:$true] %s35_s21  ;;  %s1662_s23 = int_to_ptr.vmem [resolvable:$true] %s63_s23 }
  0x34   :  { %s1463_s28 = scalar_lea.hbm %s2056_s2, 4096 }
  0x35   :  { %p1464_p7 = scmp.ne.s32.totalorder %s2056_s2, %s1463_s28  ;;  %p1467_p8 = scmp.lt.u32.totalorder %s1463_s28, %s2056_s2 }
  0x37   :  { %p1469_p9 = pnand %p1467_p8, %p1464_p7 }
  0x39   :  { %1472 = shalt.err (!%p1469_p9)
}
  0x3a   :  { %s1473_s7 = scalar_lea.vmem %s36_s21, 4096  ;;  %p1478_p11 = scmp.lt.s32.totalorder %s36_s21, %s36_s21 }
  0x3b   :  { %p1474_p10 = scmp.ne.s32.totalorder %s36_s21, %s1473_s7  ;;  %p1479_p12 = scmp.lt.s32.totalorder %s1473_s7, %s1473_s7 }
  0x3d   :  { %p1480_p13 = por %p1479_p12, %p1478_p11 }
  0x3f   :  { %p1481_p0 = pnand %p1480_p13, %p1474_p10 }
  0x41   :  { %1484 = shalt.err (!%p1481_p0)
}
  0x42   :  { %41 = dma.hbm_to_vmem [thread:$0]  %s2056_s2, 4096, %s36_s21, [#allocation7], %s1540_s24, %s1540_s24, %s1541_s25  }
  0x43   :  { %s1485_s3 = scalar_lea.hbm %s2060_s6, 512 }
  0x44   :  { %p1486_p1 = scmp.ne.s32.totalorder %s2060_s6, %s1485_s3  ;;  %p1489_p2 = scmp.lt.u32.totalorder %s1485_s3, %s2060_s6 }
  0x46   :  { %p1491_p3 = pnand %p1489_p2, %p1486_p1 }
  0x48   :  { %1494 = shalt.err (!%p1491_p3)
}
  0x49   :  { %s1495_s27 = scalar_lea.vmem %s1662_s23, 512  ;;  %p1500_p5 = scmp.lt.s32.totalorder %s1662_s23, %s1662_s23 }
  0x4a   :  { %p1496_p4 = scmp.ne.s32.totalorder %s1662_s23, %s1495_s27  ;;  %p1501_p6 = scmp.lt.s32.totalorder %s1495_s27, %s1495_s27 }
  0x4c   :  { %p1502_p7 = por %p1501_p6, %p1500_p5 }
  0x4e   :  { %p1503_p8 = pnand %p1502_p7, %p1496_p4 }
  0x50   :  { %1506 = shalt.err (!%p1503_p8)
}
  0x51   :  { %69 = dma.hbm_to_vmem [thread:$0]  %s2060_s6, 512, %s1662_s23, [#allocation9], %s1540_s24, %s1540_s24, %s1541_s25  }
  0x52   :  { %s1544_s28 = smov [#allocation13]   ;;  %s1507_s16 = scalar_lea.hbm %s2063_s9, 512 }
  0x53   :  { %s89_s29 = sshll.u32 %s1544_s28, 4  ;;  %p1508_p9 = scmp.ne.s32.totalorder %s2063_s9, %s1507_s16  ;;  %s90_s29 = int_to_ptr.vmem [resolvable:$true] %s89_s29 }
  0x54   :  { %p1511_p10 = scmp.lt.u32.totalorder %s1507_s16, %s2063_s9 }
  0x56   :  { %p1513_p11 = pnand %p1511_p10, %p1508_p9 }
  0x58   :  { %1516 = shalt.err (!%p1513_p11)
}
  0x59   :  { %s1517_s19 = scalar_lea.vmem %s90_s29, 512  ;;  %p1522_p13 = scmp.lt.s32.totalorder %s90_s29, %s90_s29 }
  0x5a   :  { %p1518_p12 = scmp.ne.s32.totalorder %s90_s29, %s1517_s19  ;;  %p1523_p0 = scmp.lt.s32.totalorder %s1517_s19, %s1517_s19 }
  0x5c   :  { %p1524_p1 = por %p1523_p0, %p1522_p13 }
  0x5e   :  { %p1525_p2 = pnand %p1524_p1, %p1518_p12 }
  0x60   :  { %1528 = shalt.err (!%p1525_p2)
}
  0x61   :  { %95 = dma.hbm_to_vmem [thread:$0]  %s2063_s9, 512, %s90_s29, [#allocation12], %s1540_s24, %s1540_s24, %s1541_s25  }
  0x62   :  { %1531 = dma.done.wait [#allocation7], 4096  }
  0x63   :  { %1532 = vsyncadd [#allocation7], 4294963200 }
  0x64   :  { %1533 = dma.done.wait [#allocation9], 1536  }
  0x65   :  { %1534 = vsyncadd [#allocation9], 4294965760 }
  0x66   :  { %1535 = dma.done.wait [#allocation12], 1024  }
  0x67   :  { %1536 = vsyncadd [#allocation12], 4294966272  ;;  %v2070_v0 = vmov 0.0|0.0   ;;  %vm1546_vm0 = vmmov 0   ;;  %v2068_v1 = vmov 0.0   ;;  %s121_s3 = sld [smem:[#allocation5]]  ;;  %v2069_v33 = vlaneseq }
  0x68   :  { %1356 = vmatprep.subr.bf16.mxu0 %v2070_v0  ;;  %1320 = vmatprep.mubr.msk.f32.mxu0 %vm1546_vm0, %v2068_v1  ;;  %s1277_s14 = sld [smem:[#allocation5 + $0x1]]  ;;  %s1278_s20 = sld [smem:[#allocation5 + $0x2]]  ;;  %vm118_vm1 = vcmask 261120   ;;  %v162_v2 = vld [vmem:[%s2058_s4] sm:$0xff]  ;;  %v163_v3 = vld [vmem:[%s2058_s4 + $0x8] sm:$0xff]  ;;  %v164_v4 = vld [vmem:[%s2058_s4 + $0x10] sm:$0xff] }
  0x69   :  { %s1279_s22 = sld [smem:[#allocation5 + $0x3]]  ;;  %1362 = vmatprep.subr.bf16.mxu1 %v2070_v0  ;;  %1331 = vmatprep.mubr.msk.f32.mxu1 %vm1546_vm0, %v2068_v1  ;;  %s1280_s9 = sld [smem:[#allocation5 + $0x4]]  ;;  %v1357_v5 = vpack.c.bf16 %v163_v3, %v162_v2  ;;  %v165_v6 = vld [vmem:[%s2058_s4 + $0x18] sm:$0xff]  ;;  %v117_v7 = vld [vmem:[%s2055_s1] sm:$0xff]  ;;  %v1755_v35 = vshrl.u32 %v2069_v33, 7  ;;  %vm588_vm2 = vcmask 1041409  }
  0x6a   :  { %s1720_s24 = sld [smem:[#allocation5 + $0x5]]  ;;  %s1722_s25 = sld [smem:[#allocation5 + $0x6]]  ;;  %119 = vst.msk [vmem:[#allocation2] sm:$0xff] %vm118_vm1, %v117_v7  ;;  %v1360_v12 = vpack.c.bf16 %v165_v6, %v164_v4  ;;  %v1284_v18 = vld [vmem:[%s2059_s5] ss:$0 sm:$0xff]  ;;  %vm590_vm3 = vcmask 1042434  }
  0x6b   :  { %s1724_s26 = sld [smem:[#allocation5 + $0x7]]  ;;  %1358 = vmatpush3.bf16.msra.mxu0 %v1357_v5  ;;  %s1549_s5 = smov 96   ;;  %v1758_v40 = vsub.s32 0, %v1755_v35  ;;  %v335_v43 = vsub.s32 1, %v1755_v35  ;;  %v355_v45 = vsub.s32 2, %v1755_v35  ;;  %v375_v47 = vsub.s32 3, %v1755_v35 }
  0x6c   :  { %1359 = vmatprep.subr.bf16.mxu0 %v2070_v0  ;;  %v395_v49 = vsub.s32 4, %v1755_v35  ;;  %v415_v51 = vsub.s32 5, %v1755_v35  ;;  %v435_v53 = vsub.s32 6, %v1755_v35  ;;  %v455_v55 = vsub.s32 7, %v1755_v35 }
  0x6d   :  { %s122_s17 = scalar_lea.vmem [#allocation8], %s121_s3  ;;  %vm592_vm4 = vcmask 1043459   ;;  %vm594_vm5 = vcmask 1044484   ;;  %vm596_vm6 = vcmask 1045509   ;;  %vm598_vm7 = vcmask 1046534  }
  0x6e   :  { %v123_v8 = vld [vmem:[%s122_s17] sm:$0x1]  ;;  %s127_s18 = scalar_lea.vmem [#allocation8], %s1277_s14  ;;  %s132_s19 = scalar_lea.vmem [#allocation8], %s1278_s20  ;;  %vm600_vm8 = vcmask 1047559   ;;  %vm579_vm9 = vcmp.lt.s32.totalorder %v1755_v35, 2 }
  0x6f   :  { %124 = vst [vmem:[#allocation3] sm:$0x1] %v123_v8  ;;  %v128_v9 = vld [vmem:[%s127_s18] sm:$0x1]  ;;  %s137_s6 = scalar_lea.vmem [#allocation8], %s1279_s22  ;;  %s142_s1 = scalar_lea.vmem [#allocation8], %s1280_s9  ;;  %1361 = vmatpush3.bf16.msra.mxu0 %v1360_v12 }
  0x70   :  { %v133_v10 = vld [vmem:[%s132_s19] sm:$0x1]  ;;  %129 = vst [vmem:[#allocation3 + $0x1] sm:$0x1] %v128_v9  ;;  %s147_s4 = scalar_lea.vmem [#allocation8], %s1720_s24  ;;  %s152_s23 = scalar_lea.vmem [#allocation8], %s1722_s25  ;;  %1368 = vmatprep.subr.bf16.mxu0 %v2070_v0 }
  0x71   :  { %v138_v11 = vld [vmem:[%s137_s6] sm:$0x1]  ;;  %134 = vst [vmem:[#allocation3 + $0x2] sm:$0x1] %v133_v10  ;;  %s157_s3 = scalar_lea.vmem [#allocation8], %s1724_s26  ;;  %s1548_s22 = smov 64  }
  0x72   :  { %139 = vst [vmem:[#allocation3 + $0x3] sm:$0x1] %v138_v11  ;;  %v143_v13 = vld [vmem:[%s142_s1] sm:$0x1]  ;;  %s1550_s9 = smov 32   ;;  %vm858_vm10 = vcmask 130112  }
  0x73   :  { %v148_v14 = vld [vmem:[%s147_s4] sm:$0x1]  ;;  %144 = vst [vmem:[#allocation3 + $0x4] sm:$0x1] %v143_v13  ;;  %v1784_v13 = vld [vmem:[#allocation6 + $0x28] sm:$0xff]  ;;  %vm865_vm11 = vcmask 195712  }
  0x74   :  { %149 = vst [vmem:[#allocation3 + $0x5] sm:$0x1] %v148_v14  ;;  %v153_v15 = vld [vmem:[%s152_s23] sm:$0x1]  ;;  %v1786_v14 = vld [vmem:[#allocation6 + $0x20] sm:$0xff]  ;;  %vm872_vm12 = vcmask 261312  }
  0x75   :  { %v158_v16 = vld [vmem:[%s157_s3] sm:$0x1]  ;;  %154 = vst [vmem:[#allocation3 + $0x6] sm:$0x1] %v153_v15  ;;  %v1788_v15 = vld [vmem:[#allocation6 + $0x8] sm:$0xff] }
  0x76   :  { %159 = vst [vmem:[#allocation3 + $0x7] sm:$0x1] %v158_v16  ;;  %v161_v17 = vld [vmem:[#allocation2] sm:$0xff]  ;;  %v1790_v16 = vld [vmem:[#allocation6] sm:$0xff] }
  0x77   :  { %1321 = vmatmul.mubr.msk.f32.vlgmr.msra.gmra.mrb[0].mxu0 %vm118_vm1, %v161_v17 }
  0x78   :  { %1342 = vmatprep.mubr.msk.f32.mxu0 %vm1546_vm0, %v2068_v1  ;;  %v1879_v1 = vld [vmem:[#allocation6 + $0xd8] sm:$0xff] }
  0x7d   :  { %v160_v22 = vld [vmem:[#allocation3] sm:$0xff] }
 0x14a   :  { %v243_v19 = vpop.f32.mrb[0].mxu0 }
 0x14b   :  { %v244_v20 = vadd.f32 %v1284_v18, %v243_v19  ;;  %v1322_v21 = vpop.f32.mrb[1].mxu0  ;;  %v1794_v18 = vld [vmem:[#allocation6 + $0x40] sm:$0xff]  ;;  %v1796_v19 = vld [vmem:[#allocation6 + $0x30] sm:$0xff] }
 0x14d   :  { %255 = vrot.lane.b32.xlu0 %v244_v20, %s1548_s22  ;;  %v247_v23 = vadd.f32 %v244_v20, %v160_v22 }
 0x14f   :  { %v1286_v24 = vmul.f32 -1.442695, %v247_v23  ;;  %v1802_v23 = vld [vmem:[#allocation6 + $0x60] sm:$0xff] }
 0x151   :  { %1395 = vpow2.f32 %v1286_v24 }
 0x15b   :  { %v1396_v25 = vpop.eup %1395 }
 0x15c   :  { %v251_v26 = vadd.f32 1.0, %v1396_v25 }
 0x15e   :  { %1397 = vrcp.f32 %v251_v26 }
 0x168   :  { %v1398_v27 = vpop.eup %1397 }
 0x169   :  { %v265_v36 = vsub.f32 1.0, %v1398_v27 }
 0x1bf   :  { %v256_v28 = vpop.permute.xlu0 %255 }
 0x1c0   :  { %v258_v29 = vmul.f32 %v1398_v27, %v256_v28  ;;  %v1806_v28 = vld [vmem:[#allocation6 + $0x10] sm:$0xff] }
 0x1c2   :  { %260 = vrot.lane.b32.xlu0 %v258_v29, %s1548_s22  ;;  %v1808_v29 = vld [vmem:[#allocation6 + $0x50] sm:$0xff] }
 0x234   :  { %v261_v30 = vpop.permute.xlu0 %260 }
 0x235   :  { %v263_v31 = vadd.f32 %v261_v30, %v160_v22  ;;  %v1800_v22 = vld [vmem:[#allocation6 + $0x68] sm:$0xff]  ;;  %v1810_v30 = vld [vmem:[#allocation6 + $0x38] sm:$0xff] }
 0x237   :  { %1399 = vtanh.f32 %v263_v31 }
 0x241   :  { %v1400_v32 = vpop.eup %1399 }
 0x242   :  { %267 = vrot.lane.b32.xlu1 %v1400_v32, %s1549_s5 }
 0x246   :  { %271 = vrot.lane.b32.xlu1 %v161_v17, %s1550_s9  ;;  %v1792_v17 = vld [vmem:[#allocation6 + $0x48] sm:$0xff] }
 0x2b4   :  { %v268_v34 = vpop.permute.xlu1 %267 }
 0x2b5   :  { %v270_v38 = vmul.f32 %v268_v34, %v265_v36  ;;  %v1815_v36 = vld [vmem:[#allocation6 + $0x70] sm:$0xff] }
 0x2b8   :  { %v272_v37 = vpop.permute.xlu1 %271 }
 0x2b9   :  { %v274_v39 = vmul.f32 %v1398_v27, %v272_v37 }
 0x2bb   :  { %v1760_v41 = vadd.f32 %v274_v39, %v270_v38  ;;  %v1819_v39 = vld [vmem:[#allocation6 + $0x18] sm:$0xff] }
 0x2bd   :  { %2078 = vst [vmem:[#allocation18_spill] sm:$0xff] %v1760_v41  ;;  %v316_v42 = vrot.slane %v1760_v41, %v1758_v40  ;;  %v336_v44 = vrot.slane %v1760_v41, %v335_v43  ;;  %v356_v46 = vrot.slane %v1760_v41, %v355_v45  ;;  %v376_v48 = vrot.slane %v1760_v41, %v375_v47 }
 0x2be   :  { %v396_v50 = vrot.slane %v1760_v41, %v395_v49  ;;  %v416_v52 = vrot.slane %v1760_v41, %v415_v51  ;;  %v436_v54 = vrot.slane %v1760_v41, %v435_v53  ;;  %v456_v56 = vrot.slane %v1760_v41, %v455_v55  ;;  %v1829_v55 = vld [vmem:[#allocation6 + $0x78] sm:$0xff] }
 0x2bf   :  { %323 = vbcast.lane.b32.xlu1 %v316_v42, 296  ;;  %319 = vbcast.lane.b32.xlu0 %v316_v42, 288 }
 0x2c3   :  { %343 = vbcast.lane.b32.xlu1 %v336_v44, 296  ;;  %339 = vbcast.lane.b32.xlu0 %v336_v44, 288 }
 0x2c7   :  { %363 = vbcast.lane.b32.xlu1 %v356_v46, 296  ;;  %359 = vbcast.lane.b32.xlu0 %v356_v46, 288 }
 0x2cb   :  { %347 = vbcast.lane.b32.xlu1 %v336_v44, 304  ;;  %327 = vbcast.lane.b32.xlu0 %v316_v42, 304 }
 0x2cf   :  { %383 = vbcast.lane.b32.xlu1 %v376_v48, 296  ;;  %379 = vbcast.lane.b32.xlu0 %v376_v48, 288 }
 0x2d3   :  { %399 = vbcast.lane.b32.xlu1 %v396_v50, 288  ;;  %367 = vbcast.lane.b32.xlu0 %v356_v46, 304 }
 0x2d7   :  { %331 = vbcast.lane.b32.xlu1 %v316_v42, 312  ;;  %403 = vbcast.lane.b32.xlu0 %v396_v50, 296  ;;  %v1821_v42 = vld [vmem:[#allocation6 + $0x58] sm:$0xff] }
 0x2db   :  { %387 = vbcast.lane.b32.xlu1 %v376_v48, 304  ;;  %351 = vbcast.lane.b32.xlu0 %v336_v44, 312 }
 0x2df   :  { %423 = vbcast.lane.b32.xlu1 %v416_v52, 296  ;;  %419 = vbcast.lane.b32.xlu0 %v416_v52, 288 }
 0x2e3   :  { %407 = vbcast.lane.b32.xlu1 %v396_v50, 304  ;;  %371 = vbcast.lane.b32.xlu0 %v356_v46, 312 }
 0x2e7   :  { %443 = vbcast.lane.b32.xlu1 %v436_v54, 296  ;;  %439 = vbcast.lane.b32.xlu0 %v436_v54, 288 }
 0x2eb   :  { %427 = vbcast.lane.b32.xlu1 %v416_v52, 304  ;;  %391 = vbcast.lane.b32.xlu0 %v376_v48, 312 }
 0x2ef   :  { %463 = vbcast.lane.b32.xlu1 %v456_v56, 296  ;;  %459 = vbcast.lane.b32.xlu0 %v456_v56, 288 }
 0x2f3   :  { %447 = vbcast.lane.b32.xlu1 %v436_v54, 304  ;;  %411 = vbcast.lane.b32.xlu0 %v396_v50, 312 }
 0x2f7   :  { %467 = vbcast.lane.b32.xlu1 %v456_v56, 304  ;;  %431 = vbcast.lane.b32.xlu0 %v416_v52, 312 }
 0x2fb   :  { %471 = vbcast.lane.b32.xlu1 %v456_v56, 312  ;;  %451 = vbcast.lane.b32.xlu0 %v436_v54, 312 }
 0x331   :  { %v324_v57 = vpop.permute.xlu1 %323  ;;  %v320_v58 = vpop.permute.xlu0 %319 }
 0x332   :  { %v474_v26 = vmul.f32 %v324_v57, %v1788_v15  ;;  %v473_v27 = vmul.f32 %v320_v58, %v1790_v16 }
 0x334   :  { %v505_v49 = vadd.f32 %v474_v26, %v473_v27 }
 0x335   :  { %v344_v59 = vpop.permute.xlu1 %343  ;;  %v340_v60 = vpop.permute.xlu0 %339 }
 0x336   :  { %v478_v20 = vmul.f32 %v344_v59, %v1784_v13  ;;  %v477_v21 = vmul.f32 %v340_v60, %v1786_v14  ;;  %v1831_v59 = vld [vmem:[#allocation6 + $0x88] sm:$0xff] }
 0x338   :  { %v514_v43 = vadd.f32 %v478_v20, %v477_v21  ;;  %v1841_v20 = vld [vmem:[#allocation6 + $0xa0] sm:$0xff] }
 0x339   :  { %v364_v61 = vpop.permute.xlu1 %363  ;;  %v360_v62 = vpop.permute.xlu0 %359 }
 0x33a   :  { %v482_v31 = vmul.f32 %v364_v61, %v1792_v17  ;;  %v481_v32 = vmul.f32 %v360_v62, %v1794_v18 }
 0x33c   :  { %v523_v51 = vadd.f32 %v482_v31, %v481_v32 }
 0x33d   :  { %v348_v63 = vpop.permute.xlu1 %347  ;;  %v328_v2 = vpop.permute.xlu0 %327 }
 0x33e   :  { %v479_v34 = vmul.f32 %v348_v63, %v1796_v19  ;;  %v475_v44 = vmul.f32 %v328_v2, %v1806_v28 }
 0x340   :  { %v515_v52 = vadd.f32 %v514_v43, %v479_v34  ;;  %v506_v57 = vadd.f32 %v505_v49, %v475_v44  ;;  %v1850_v43 = vld [vmem:[#allocation6 + $0xb0] sm:$0xff]  ;;  %v1852_v44 = vld [vmem:[#allocation6 + $0x98] sm:$0xff] }
 0x341   :  { %v384_v3 = vpop.permute.xlu1 %383  ;;  %v380_v4 = vpop.permute.xlu0 %379 }
 0x342   :  { %v486_v37 = vmul.f32 %v384_v3, %v1800_v22  ;;  %v485_v38 = vmul.f32 %v380_v4, %v1802_v23  ;;  %v1834_v3 = vld [vmem:[#allocation6 + $0x80] sm:$0xff] }
 0x344   :  { %v532_v56 = vadd.f32 %v486_v37, %v485_v38 }
 0x345   :  { %v1778_v5 = vpop.permute.xlu1 %399  ;;  %v368_v6 = vpop.permute.xlu0 %367 }
 0x346   :  { %v483_v45 = vmul.f32 %v368_v6, %v1808_v29  ;;  %v1836_v6 = vld [vmem:[#allocation6 + $0x90] sm:$0xff]  ;;  %v489_v31 = vmul.f32 %v1778_v5, %v1834_v3  ;;  %v1856_v5 = vld [vmem:[#allocation6 + $0xe0] sm:$0xff] }
 0x347   :  { %2080 = vst [vmem:[#allocation20_spill] sm:$0xff] %v1856_v5 }
 0x348   :  { %v524_v58 = vadd.f32 %v523_v51, %v483_v45 }
 0x349   :  { %v332_v7 = vpop.permute.xlu1 %331  ;;  %v404_v8 = vpop.permute.xlu0 %403 }
 0x34a   :  { %v476_v53 = vmul.f32 %v332_v7, %v1819_v39 }
 0x34c   :  { %v507_v4 = vadd.f32 %v506_v57, %v476_v53  ;;  %v1858_v53 = vld [vmem:[#allocation6 + $0xc8] sm:$0xff] }
 0x34d   :  { %v388_v9 = vpop.permute.xlu1 %387  ;;  %v352_v10 = vpop.permute.xlu0 %351 }
 0x34e   :  { %v480_v46 = vmul.f32 %v352_v10, %v1810_v30  ;;  %v487_v50 = vmul.f32 %v388_v9, %v1815_v36  ;;  %v490_v9 = vmul.f32 %v404_v8, %v1831_v59  ;;  %v1839_v10 = vld [vmem:[#allocation6 + $0xa8] sm:$0xff]  ;;  %v508_v34 = vrot.slane %v507_v4, 4 }
 0x350   :  { %v516_v60 = vadd.f32 %v515_v52, %v480_v46  ;;  %v533_v63 = vadd.f32 %v532_v56, %v487_v50  ;;  %v541_v45 = vadd.f32 %v490_v9, %v489_v31  ;;  %v1854_v50 = vld [vmem:[#allocation6 + $0xe8] sm:$0xff]  ;;  %v509_v56 = vadd.f32 %v508_v34, %v507_v4 }
 0x351   :  { %v1780_v11 = vpop.permute.xlu1 %423  ;;  %v1782_v12 = vpop.permute.xlu0 %419  ;;  %2079 = vst [vmem:[#allocation19_spill] sm:$0xff] %v1854_v50 }
 0x352   :  { %v494_v37 = vmul.f32 %v1780_v11, %v1839_v10  ;;  %v493_v8 = vmul.f32 %v1782_v12, %v1841_v20  ;;  %v1860_v11 = vld [vmem:[#allocation6 + $0xc0] sm:$0xff] }
 0x353   :  { %2081 = vst [vmem:[#allocation21_spill] sm:$0xff] %v1860_v11 }
 0x354   :  { %v550_v57 = vadd.f32 %v494_v37, %v493_v8 }
 0x355   :  { %v408_v24 = vpop.permute.xlu1 %407  ;;  %v372_v25 = vpop.permute.xlu0 %371 }
 0x356   :  { %v484_v54 = vmul.f32 %v372_v25, %v1821_v42  ;;  %v517_v25 = vrot.slane %v516_v60, 4  ;;  %v491_v32 = vmul.f32 %v408_v24, %v1836_v6 }
 0x358   :  { %v525_v7 = vadd.f32 %v524_v58, %v484_v54  ;;  %v518_v49 = vadd.f32 %v517_v25, %v516_v60  ;;  %v542_v52 = vadd.f32 %v541_v45, %v491_v32  ;;  %v1866_v60 = vld [vmem:[#allocation6 + $0xb8] sm:$0xff]  ;;  %v1870_v25 = vld [vmem:[#allocation6 + $0xd0] sm:$0xff] }
 0x359   :  { %v444_v47 = vpop.permute.xlu1 %443  ;;  %v440_v48 = vpop.permute.xlu0 %439  ;;  %2083 = vst [vmem:[#allocation23_spill] sm:$0xff] %v1866_v60 }
 0x35a   :  { %v526_v38 = vrot.slane %v525_v7, 4  ;;  %v519_v32 = vrot.slane %v518_v49, 2  ;;  %v497_v45 = vmul.f32 %v440_v48, %v1860_v11 }
 0x35c   :  { %v527_v58 = vadd.f32 %v526_v38, %v525_v7  ;;  %v510_v38 = vrot.slane %v509_v56, 2  ;;  %v520_v48 = vadd.f32 %v519_v32, %v518_v49 }
 0x35d   :  { %v428_v61 = vpop.permute.xlu1 %427  ;;  %v392_v62 = vpop.permute.xlu0 %391 }
 0x35e   :  { %v488_v2 = vmul.f32 %v392_v62, %v1829_v55  ;;  %v495_v12 = vmul.f32 %v428_v61, %v1850_v43  ;;  %v1864_v62 = vld [vmem:[#allocation6 + $0xf0] sm:$0xff]  ;;  %v498_v61 = vmul.f32 %v444_v47, %v1858_v53 }
 0x35f   :  { %2082 = vst [vmem:[#allocation22_spill] sm:$0xff] %v1864_v62 }
 0x360   :  { %v534_v21 = vadd.f32 %v533_v63, %v488_v2  ;;  %v551_v7 = vadd.f32 %v550_v57, %v495_v12  ;;  %v559_v33 = vadd.f32 %v498_v61, %v497_v45 }
 0x361   :  { %v464_v26 = vpop.permute.xlu1 %463  ;;  %v460_v27 = vpop.permute.xlu0 %459 }
 0x362   :  { %v535_v46 = vrot.slane %v534_v21, 4  ;;  %v502_v2 = vmul.f32 %v464_v26, %v1854_v50  ;;  %v501_v9 = vmul.f32 %v460_v27, %v1856_v5  ;;  %v528_v26 = vrot.slane %v527_v58, 2 }
 0x363   :  { %v511_v50 = vadd.f32 %v510_v38, %v509_v56 }
 0x364   :  { %v536_v63 = vadd.f32 %v535_v46, %v534_v21  ;;  %v1877_v46 = vld [vmem:[#allocation6 + $0xf8] sm:$0xff]  ;;  %v529_v5 = vadd.f32 %v528_v26, %v527_v58 }
 0x365   :  { %v448_v24 = vpop.permute.xlu1 %447  ;;  %v412_v51 = vpop.permute.xlu0 %411 }
 0x366   :  { %v492_v54 = vmul.f32 %v412_v51, %v1852_v44  ;;  %v499_v27 = vmul.f32 %v448_v24, %v1870_v25  ;;  %v537_v51 = vrot.slane %v536_v63, 2  ;;  %v530_v61 = vrot.slane %v529_v5, 1 }
 0x368   :  { %v543_v31 = vadd.f32 %v542_v52, %v492_v54  ;;  %v568_v52 = vadd.f32 %v502_v2, %v501_v9  ;;  %v531_v56 = vadd.f32 %v530_v61, %v529_v5 }
 0x369   :  { %v468_v4 = vpop.permute.xlu1 %467  ;;  %v432_v34 = vpop.permute.xlu0 %431 }
 0x36a   :  { %v544_v37 = vrot.slane %v543_v31, 4  ;;  %v503_v8 = vmul.f32 %v468_v4, %v1864_v62  ;;  %v496_v21 = vmul.f32 %v432_v34, %v1866_v60  ;;  %v560_v62 = vadd.f32 %v559_v33, %v499_v27 }
 0x36b   :  { %v538_v60 = vadd.f32 %v537_v51, %v536_v63 }
 0x36c   :  { %v545_v54 = vadd.f32 %v544_v37, %v543_v31  ;;  %v552_v47 = vadd.f32 %v551_v7, %v496_v21  ;;  %v569_v4 = vadd.f32 %v568_v52, %v503_v8  ;;  %v521_v37 = vrot.slane %v520_v48, 1 }
 0x36d   :  { %v472_v12 = vpop.permute.xlu1 %471  ;;  %v452_v57 = vpop.permute.xlu0 %451  ;;  %v512_v21 = vrot.slane %v511_v50, 1  ;;  %v539_v8 = vrot.slane %v538_v60, 1 }
 0x36e   :  { %v546_v0 = vrot.slane %v545_v54, 2  ;;  %v553_v41 = vrot.slane %v552_v47, 4  ;;  %v504_v34 = vmul.f32 %v472_v12, %v1877_v46  ;;  %v500_v24 = vmul.f32 %v452_v57, %v1879_v1 }
 0x36f   :  { %v522_v33 = vadd.f32 %v521_v37, %v520_v48  ;;  %v513_v63 = vadd.f32 %v512_v21, %v511_v50 }
 0x370   :  { %v554_v2 = vadd.f32 %v553_v41, %v552_v47  ;;  %v570_v9 = vadd.f32 %v569_v4, %v504_v34  ;;  %v547_v31 = vadd.f32 %v546_v0, %v545_v54  ;;  %v561_v7 = vadd.f32 %v560_v62, %v500_v24 }
 0x371   :  { %v540_v0 = vadd.f32 %v539_v8, %v538_v60  ;;  %v589_v54 = vsel %vm588_vm2, %v522_v33, %v513_v63 }
 0x372   :  { %v555_v49 = vrot.slane %v554_v2, 2  ;;  %v571_v32 = vrot.slane %v570_v9, 4  ;;  %v562_v45 = vrot.slane %v561_v7, 4  ;;  %v548_v12 = vrot.slane %v547_v31, 1 }
 0x373   :  { %v591_v4 = vsel %vm590_vm3, %v531_v56, %v589_v54  ;;  %v1551_v56 = vmov 1966171168  }
 0x374   :  { %v556_v52 = vadd.f32 %v555_v49, %v554_v2  ;;  %v572_v11 = vadd.f32 %v571_v32, %v570_v9  ;;  %v563_v58 = vadd.f32 %v562_v45, %v561_v7  ;;  %v549_v38 = vadd.f32 %v548_v12, %v547_v31 }
 0x375   :  { %v593_v34 = vsel %vm592_vm4, %v540_v0, %v591_v4 }
 0x376   :  { %v557_v26 = vrot.slane %v556_v52, 1  ;;  %v573_v27 = vrot.slane %v572_v11, 2  ;;  %v564_v41 = vrot.slane %v563_v58, 2  ;;  %v595_v50 = vsel %vm594_vm5, %v549_v38, %v593_v34 }
 0x378   :  { %v574_v62 = vadd.f32 %v573_v27, %v572_v11  ;;  %v565_v51 = vadd.f32 %v564_v41, %v563_v58  ;;  %v558_v47 = vadd.f32 %v557_v26, %v556_v52  ;;  %v624_v41 = vunpack.c.l.s4 %v1551_v56 }
 0x37a   :  { %v575_v57 = vrot.slane %v574_v62, 1  ;;  %v566_v48 = vrot.slane %v565_v51, 1  ;;  %v597_v60 = vsel %vm596_vm6, %v558_v47, %v595_v50  ;;  %v625_v63 = vunpack.c.0.s8 %v624_v41 }
 0x37c   :  { %v576_v5 = vadd.f32 %v575_v57, %v574_v62  ;;  %v567_v11 = vadd.f32 %v566_v48, %v565_v51  ;;  %v628_v0 = vsub.s32 %v625_v63, %v1755_v35  ;;  %v2088_v63 = vld [vmem:[#allocation20_spill] sm:$0xff] }
 0x37e   :  { %v599_v24 = vsel %vm598_vm7, %v567_v11, %v597_v60 }
 0x37f   :  { %v601_v2 = vsel %vm600_vm8, %v576_v5, %v599_v24 }
 0x380   :  { %v603_v9 = vsel %vm579_vm9, %v601_v2, -1e+30 }
 0x381   :  { %v604_v31 = vrot.slane %v603_v9, 4 }
 0x383   :  { %v605_v7 = vmax.f32 %v603_v9, %v604_v31 }
 0x385   :  { %v606_v37 = vrot.slane %v605_v7, 2 }
 0x387   :  { %v607_v49 = vmax.f32 %v605_v7, %v606_v37 }
 0x389   :  { %v608_v32 = vrot.slane %v607_v49, 1 }
 0x38b   :  { %v609_v61 = vmax.f32 %v607_v49, %v608_v32 }
 0x38d   :  { %v610_v45 = vsub.f32 %v603_v9, %v609_v61 }
 0x38f   :  { %v611_v21 = vmul.f32 1.442695, %v610_v45 }
 0x391   :  { %1401 = vpow2.f32 %v611_v21 }
 0x39b   :  { %v1402_v8 = vpop.eup %1401 }
 0x39c   :  { %v613_v52 = vrot.slane %v1402_v8, 4 }
 0x39e   :  { %v614_v12 = vadd.f32 %v1402_v8, %v613_v52 }
 0x3a0   :  { %v615_v58 = vrot.slane %v614_v12, 2 }
 0x3a2   :  { %v616_v33 = vadd.f32 %v615_v58, %v614_v12 }
 0x3a4   :  { %v617_v26 = vrot.slane %v616_v33, 1 }
 0x3a6   :  { %v618_v27 = vadd.f32 %v617_v26, %v616_v33 }
 0x3a8   :  { %1403 = vrcp.f32 %v618_v27  ;;  %v2086_v27 = vld [vmem:[#allocation19_spill] sm:$0xff] }
 0x3b2   :  { %v1404_v62 = vpop.eup %1403 }
 0x3b3   :  { %v620_v38 = vmul.f32 %v1404_v62, %v1402_v8  ;;  %v808_v62 = vld [vmem:[#allocation10 + $0x8] sm:$0xff] }
 0x3b5   :  { %v629_v51 = vrot.slane %v620_v38, %v628_v0  ;;  %1252 = vst [vmem:[%s2067_s13] sm:$0xff] %v620_v38  ;;  %v622_v24 = vcombine.high %v620_v38, %v620_v38 }
 0x3b7   :  { %v645_v54 = vrot.slane %v629_v51, %v628_v0  ;;  %v637_v47 = vcombine.high %v629_v51, %v629_v51  ;;  %v636_v31 = vrot.slane %v622_v24, %v628_v0  ;;  %v809_v51 = vld [vmem:[#allocation10 + $0x10] sm:$0xff] }
 0x3b9   :  { %v674_v57 = vrot.slane %v645_v54, %v1758_v40  ;;  %v659_v4 = vrot.slane %v637_v47, %v628_v0  ;;  %v667_v60 = vcombine.high %v645_v54, %v645_v54  ;;  %v810_v54 = vld [vmem:[#allocation10 + $0x18] sm:$0xff]  ;;  %v2089_v47 = vld [vmem:[#allocation18_spill] sm:$0xff] }
 0x3bb   :  { %v712_v48 = vmul.f32 %v674_v57, %v1788_v15  ;;  %v711_v34 = vmul.f32 %v674_v57, %v1790_v16  ;;  %v678_v5 = vrot.slane %v659_v4, %v1758_v40  ;;  %v713_v50 = vmul.f32 %v674_v57, %v1806_v28 }
 0x3bc   :  { %v714_v2 = vmul.f32 %v674_v57, %v1819_v39  ;;  %v682_v15 = vrot.slane %v667_v60, %v1758_v40  ;;  %v652_v28 = vrot.slane %v636_v31, %v628_v0  ;;  %v669_v32 = vcombine.high %v659_v4, %v659_v4  ;;  %v811_v4 = vld [vmem:[#allocation11] sm:$0xff] }
 0x3bd   :  { %745 = vadd.xlane.f32.xlu1 %v712_v48  ;;  %743 = vadd.xlane.f32.xlu0 %v711_v34  ;;  %v715_v11 = vmul.f32 %v678_v5, %v1786_v14  ;;  %v716_v9 = vmul.f32 %v678_v5, %v1784_v13  ;;  %v717_v7 = vmul.f32 %v678_v5, %v1796_v19  ;;  %v812_v48 = vld [vmem:[#allocation11 + $0x8] sm:$0xff] }
 0x3be   :  { %v719_v16 = vmul.f32 %v682_v15, %v1794_v18  ;;  %v721_v14 = vmul.f32 %v682_v15, %v1808_v29  ;;  %v720_v37 = vmul.f32 %v682_v15, %v1792_v17  ;;  %v690_v39 = vrot.slane %v652_v28, %v1758_v40 }
 0x3bf   :  { %v718_v13 = vmul.f32 %v678_v5, %v1810_v30  ;;  %v722_v18 = vmul.f32 %v682_v15, %v1821_v42  ;;  %v686_v61 = vrot.slane %v669_v32, %v1758_v40  ;;  %v638_v29 = vcombine.high %v636_v31, %v636_v31  ;;  %v814_v5 = vld [vmem:[#allocation11 + $0x18] sm:$0xff] }
 0x3c0   :  { %v728_v49 = vmul.f32 %v690_v39, %v1831_v59  ;;  %v729_v19 = vmul.f32 %v690_v39, %v1836_v6  ;;  %v727_v45 = vmul.f32 %v690_v39, %v1834_v3  ;;  %v730_v59 = vmul.f32 %v690_v39, %v1852_v44 }
 0x3c1   :  { %747 = vadd.xlane.f32.xlu1 %v713_v50  ;;  %751 = vadd.xlane.f32.xlu0 %v715_v11  ;;  %v724_v17 = vmul.f32 %v686_v61, %v1800_v22  ;;  %v666_v21 = vrot.slane %v638_v29, %v628_v0  ;;  %v725_v30 = vmul.f32 %v686_v61, %v1815_v36 }
 0x3c2   :  { %v723_v6 = vmul.f32 %v686_v61, %v1802_v23  ;;  %v668_v52 = vcombine.high %v652_v28, %v652_v28  ;;  %v726_v22 = vmul.f32 %v686_v61, %v1829_v55  ;;  %v2085_v55 = vld [vmem:[#allocation23_spill] sm:$0xff]  ;;  %v1372_v57 = vpack.c.bf16 %v810_v54, %v809_v51 }
 0x3c3   :  { %v694_v42 = vrot.slane %v666_v21, %v1758_v40  ;;  %v670_v58 = vcombine.high %v666_v21, %v666_v21  ;;  %v1363_v34 = vpack.c.bf16 %v812_v48, %v811_v4 }
 0x3c4   :  { %v698_v12 = vrot.slane %v668_v52, %v1758_v40 }
 0x3c5   :  { %749 = vadd.xlane.f32.xlu1 %v714_v2  ;;  %753 = vadd.xlane.f32.xlu0 %v716_v9  ;;  %v732_v8 = vmul.f32 %v694_v42, %v1839_v10  ;;  %v733_v3 = vmul.f32 %v694_v42, %v1850_v43  ;;  %v731_v44 = vmul.f32 %v694_v42, %v1841_v20  ;;  %v2084_v10 = vld [vmem:[#allocation21_spill] sm:$0xff]  ;;  %v2087_v20 = vld [vmem:[#allocation22_spill] sm:$0xff] }
 0x3c6   :  { %v736_v36 = vmul.f32 %v698_v12, %v1858_v53  ;;  %v737_v23 = vmul.f32 %v698_v12, %v1870_v25  ;;  %v735_v33 = vmul.f32 %v698_v12, %v2084_v10  ;;  %v702_v26 = vrot.slane %v670_v58, %v1758_v40  ;;  %v807_v40 = vld [vmem:[#allocation10] sm:$0xff]  ;;  %1364 = vmatpush3.bf16.msra.mxu1 %v1363_v34 }
 0x3c7   :  { %v734_v43 = vmul.f32 %v694_v42, %v2085_v55  ;;  %v738_v53 = vmul.f32 %v698_v12, %v1879_v1  ;;  %v1369_v38 = vpack.c.bf16 %v808_v62, %v807_v40  ;;  %v2090_v1 = vmov 0.0|0.0  }
 0x3c8   :  { %v740_v56 = vmul.f32 %v702_v26, %v2086_v27  ;;  %v741_v41 = vmul.f32 %v702_v26, %v2087_v20  ;;  %v739_v25 = vmul.f32 %v702_v26, %v2088_v63  ;;  %v742_v0 = vmul.f32 %v702_v26, %v1877_v46  ;;  %1365 = vmatprep.subr.bf16.mxu1 %v2090_v1  ;;  %v813_v46 = vld [vmem:[#allocation11 + $0x10] sm:$0xff] }
 0x3c9   :  { %759 = vadd.xlane.f32.xlu1 %v719_v16  ;;  %755 = vadd.xlane.f32.xlu0 %v717_v7  ;;  %v1366_v50 = vpack.c.bf16 %v814_v5, %v813_v46 }
 0x3ca   :  { %1370 = vmatpush3.bf16.msra.mxu0 %v1369_v38 }
 0x3cb   :  { %1371 = vmatprep.subr.bf16.mxu0 %v2090_v1  ;;  %1367 = vmatpush3.bf16.msra.mxu1 %v1366_v50 }
 0x3cc   :  { %1374 = vmatprep.subr.bf16.mxu1 %v2090_v1 }
 0x3cd   :  { %763 = vadd.xlane.f32.xlu1 %v721_v14  ;;  %761 = vadd.xlane.f32.xlu0 %v720_v37 }
 0x3ce   :  { %1373 = vmatpush3.bf16.msra.mxu0 %v1372_v57 }
 0x3d1   :  { %757 = vadd.xlane.f32.xlu0 %v718_v13  ;;  %777 = vadd.xlane.f32.xlu1 %v728_v49 }
 0x3d5   :  { %765 = vadd.xlane.f32.xlu0 %v722_v18  ;;  %779 = vadd.xlane.f32.xlu1 %v729_v19 }
 0x3d9   :  { %769 = vadd.xlane.f32.xlu1 %v724_v17  ;;  %775 = vadd.xlane.f32.xlu0 %v727_v45  ;;  %v2091_v17 = vlaneseq }
 0x3db   :  { %v848_v45 = vand.u32 127, %v2091_v17 }
 0x3dd   :  { %771 = vadd.xlane.f32.xlu1 %v725_v30  ;;  %781 = vadd.xlane.f32.xlu0 %v730_v59  ;;  %v853_v59 = vadd.s32 4294967288, %v848_v45  ;;  %v860_v42 = vadd.s32 4294967280, %v848_v45 }
 0x3df   :  { %v1958_v12 = vsub.s32 %v860_v42, %v1755_v35 }
 0x3e1   :  { %767 = vadd.xlane.f32.xlu0 %v723_v6  ;;  %785 = vadd.xlane.f32.xlu1 %v732_v8  ;;  %v867_v6 = vadd.s32 4294967272, %v848_v45 }
 0x3e5   :  { %773 = vadd.xlane.f32.xlu0 %v726_v22  ;;  %787 = vadd.xlane.f32.xlu1 %v733_v3  ;;  %v1952_v22 = vsub.s32 %v853_v59, %v1755_v35  ;;  %v1955_v3 = vsub.s32 %v848_v45, %v1755_v35 }
 0x3e9   :  { %793 = vadd.xlane.f32.xlu1 %v736_v36  ;;  %783 = vadd.xlane.f32.xlu0 %v731_v44  ;;  %v1961_v36 = vsub.s32 %v867_v6, %v1755_v35 }
 0x3ed   :  { %795 = vadd.xlane.f32.xlu1 %v737_v23  ;;  %791 = vadd.xlane.f32.xlu0 %v735_v33 }
 0x3f1   :  { %789 = vadd.xlane.f32.xlu0 %v734_v43  ;;  %801 = vadd.xlane.f32.xlu1 %v740_v56 }
 0x3f5   :  { %797 = vadd.xlane.f32.xlu0 %v738_v53  ;;  %803 = vadd.xlane.f32.xlu1 %v741_v41 }
 0x3f9   :  { %799 = vadd.xlane.f32.xlu0 %v739_v25 }
 0x3fd   :  { %805 = vadd.xlane.f32.xlu0 %v742_v0 }
 0x406   :  { %277 = vrot.lane.b32.xlu1 %v2089_v47, %s1549_s5 }
 0x44a   :  { %v746_v11 = vpop.xlane.xlu1 %745  ;;  %v744_v60 = vpop.xlane.xlu0 %743 }
 0x44b   :  { %v857_v10 = vrot.slane %v746_v11, %v1952_v22  ;;  %v852_v33 = vrot.slane %v744_v60, %v1955_v3 }
 0x44d   :  { %v859_v0 = vsel %vm858_vm10, %v857_v10, %v852_v33 }
 0x44e   :  { %v748_v24 = vpop.xlane.xlu1 %747  ;;  %v752_v2 = vpop.xlane.xlu0 %751 }
 0x44f   :  { %v877_v55 = vrot.slane %v752_v2, %v1955_v3  ;;  %v864_v35 = vrot.slane %v748_v24, %v1958_v12 }
 0x451   :  { %v866_v4 = vsel %vm865_vm11, %v864_v35, %v859_v0 }
 0x452   :  { %v750_v9 = vpop.xlane.xlu1 %749  ;;  %v754_v15 = vpop.xlane.xlu0 %753 }
 0x453   :  { %v881_v44 = vrot.slane %v754_v15, %v1952_v22  ;;  %v871_v53 = vrot.slane %v750_v9, %v1961_v36 }
 0x455   :  { %v882_v20 = vsel %vm858_vm10, %v881_v44, %v877_v55  ;;  %v873_v5 = vsel %vm872_vm12, %v871_v53, %v866_v4  ;;  %v2092_v53 = vmov 0.0   ;;  %v1290_v4 = vld [vmem:[%s2064_s10] ss:$0 sm:$0xff] }
 0x456   :  { %v760_v31 = vpop.xlane.xlu1 %759  ;;  %v756_v16 = vpop.xlane.xlu0 %755 }
 0x457   :  { %v886_v26 = vrot.slane %v756_v16, %v1958_v12  ;;  %v896_v41 = vrot.slane %v760_v31, %v1955_v3 }
 0x459   :  { %v887_v40 = vsel %vm865_vm11, %v886_v26, %v882_v20  ;;  %v1168_v20 = vld [vmem:[#allocation13 + $0x8] sm:$0xff] }
 0x45a   :  { %v1940_v7 = vpop.xlane.xlu1 %763  ;;  %v762_v28 = vpop.xlane.xlu0 %761 }
 0x45b   :  { %v900_v43 = vrot.slane %v762_v28, %v1952_v22  ;;  %v905_v62 = vrot.slane %v1940_v7, %v1958_v12 }
 0x45d   :  { %v901_v51 = vsel %vm858_vm10, %v900_v43, %v896_v41  ;;  %v1169_v41 = vld [vmem:[#allocation13 + $0x10] sm:$0xff] }
 0x45e   :  { %v758_v14 = vpop.xlane.xlu0 %757  ;;  %v1942_v37 = vpop.xlane.xlu1 %777  ;;  %v906_v15 = vsel %vm865_vm11, %v905_v62, %v901_v51 }
 0x45f   :  { %v891_v27 = vrot.slane %v758_v14, %v1961_v36  ;;  %v938_v50 = vrot.slane %v1942_v37, %v1952_v22 }
 0x461   :  { %v892_v54 = vsel %vm872_vm12, %v891_v27, %v887_v40 }
 0x462   :  { %v766_v39 = vpop.xlane.xlu0 %765  ;;  %v1944_v13 = vpop.xlane.xlu1 %779  ;;  %v1007_v9 = vsel %vm588_vm2, %v892_v54, %v873_v5 }
 0x463   :  { %v910_v47 = vrot.slane %v766_v39, %v1961_v36  ;;  %v943_v42 = vrot.slane %v1944_v13, %v1958_v12 }
 0x465   :  { %v911_v16 = vsel %vm872_vm12, %v910_v47, %v906_v15 }
 0x466   :  { %v770_v49 = vpop.xlane.xlu1 %769  ;;  %v776_v32 = vpop.xlane.xlu0 %775  ;;  %v1008_v59 = vsel %vm590_vm3, %v911_v16, %v1007_v9 }
 0x467   :  { %v919_v38 = vrot.slane %v770_v49, %v1952_v22  ;;  %v934_v57 = vrot.slane %v776_v32, %v1955_v3 }
 0x469   :  { %v939_v7 = vsel %vm858_vm10, %v938_v50, %v934_v57 }
 0x46a   :  { %v772_v18 = vpop.xlane.xlu1 %771  ;;  %v1946_v19 = vpop.xlane.xlu0 %781 }
 0x46b   :  { %v924_v11 = vrot.slane %v772_v18, %v1958_v12  ;;  %v948_v18 = vrot.slane %v1946_v19, %v1961_v36 }
 0x46e   :  { %v768_v61 = vpop.xlane.xlu0 %767  ;;  %v786_v29 = vpop.xlane.xlu1 %785 }
 0x46f   :  { %v915_v56 = vrot.slane %v768_v61, %v1955_v3  ;;  %v957_v31 = vrot.slane %v786_v29, %v1952_v22 }
 0x471   :  { %v920_v48 = vsel %vm858_vm10, %v919_v38, %v915_v56  ;;  %v1289_v38 = vld [vmem:[%s2062_s8] ss:$0 sm:$0xff] }
 0x472   :  { %v774_v21 = vpop.xlane.xlu0 %773  ;;  %v1949_v30 = vpop.xlane.xlu1 %787  ;;  %v925_v28 = vsel %vm865_vm11, %v924_v11, %v920_v48 }
 0x473   :  { %v929_v34 = vrot.slane %v774_v21, %v1961_v36  ;;  %v962_v61 = vrot.slane %v1949_v30, %v1958_v12 }
 0x475   :  { %v930_v37 = vsel %vm872_vm12, %v929_v34, %v925_v28 }
 0x476   :  { %v794_v8 = vpop.xlane.xlu1 %793  ;;  %v784_v52 = vpop.xlane.xlu0 %783  ;;  %v1009_v30 = vsel %vm592_vm4, %v930_v37, %v1008_v59 }
 0x477   :  { %v953_v46 = vrot.slane %v784_v52, %v1955_v3  ;;  %v976_v14 = vrot.slane %v794_v8, %v1952_v22  ;;  %v944_v52 = vsel %vm865_vm11, %v943_v42, %v939_v7 }
 0x479   :  { %v958_v39 = vsel %vm858_vm10, %v957_v31, %v953_v46 }
 0x47a   :  { %v1964_v58 = vpop.xlane.xlu1 %795  ;;  %v792_v23 = vpop.xlane.xlu0 %791  ;;  %v963_v8 = vsel %vm865_vm11, %v962_v61, %v958_v39 }
 0x47b   :  { %v972_v60 = vrot.slane %v792_v23, %v1955_v3  ;;  %v981_v49 = vrot.slane %v1964_v58, %v1958_v12  ;;  %v949_v58 = vsel %vm872_vm12, %v948_v18, %v944_v52 }
 0x47c   :  { %v1010_v33 = vsel %vm594_vm5, %v949_v58, %v1009_v30 }
 0x47d   :  { %v977_v29 = vsel %vm858_vm10, %v976_v14, %v972_v60 }
 0x47e   :  { %v790_v63 = vpop.xlane.xlu0 %789  ;;  %v802_v25 = vpop.xlane.xlu1 %801 }
 0x47f   :  { %v967_v32 = vrot.slane %v790_v63, %v1961_v36  ;;  %v995_v6 = vrot.slane %v802_v25, %v1952_v22  ;;  %v982_v22 = vsel %vm865_vm11, %v981_v49, %v977_v29 }
 0x481   :  { %v968_v13 = vsel %vm872_vm12, %v967_v32, %v963_v8 }
 0x482   :  { %v798_v24 = vpop.xlane.xlu0 %797  ;;  %v804_v2 = vpop.xlane.xlu1 %803  ;;  %v1011_v55 = vsel %vm596_vm6, %v968_v13, %v1010_v33 }
 0x483   :  { %v986_v17 = vrot.slane %v798_v24, %v1961_v36 }
 0x485   :  { %v987_v23 = vsel %vm872_vm12, %v986_v17, %v982_v22 }
 0x486   :  { %v278_v45 = vpop.permute.xlu1 %277  ;;  %v800_v21 = vpop.xlane.xlu0 %799  ;;  %v1012_v35 = vsel %vm598_vm7, %v987_v23, %v1011_v55 }
 0x487   :  { %280 = vst.msk [vmem:[#allocation2] sm:$0xff] %vm118_vm1, %v278_v45  ;;  %1253 = vst.msk [vmem:[%s2066_s12] sm:$0xff] %vm118_vm1, %v278_v45  ;;  %v991_v19 = vrot.slane %v800_v21, %v1955_v3  ;;  %1343 = vmatmul.mubr.msk.f32.vlgmr.msra.gmra.mrb[2].mxu0 %vm118_vm1, %v278_v45  ;;  %v1000_v3 = vrot.slane %v804_v2, %v1958_v12  ;;  %v1167_v12 = vld [vmem:[#allocation13] sm:$0xff] }
 0x488   :  { %v1375_v63 = vpack.c.bf16 %v1168_v20, %v1167_v12 }
 0x489   :  { %v996_v44 = vsel %vm858_vm10, %v995_v6, %v991_v19 }
 0x48a   :  { %v806_v10 = vpop.xlane.xlu0 %805  ;;  %v1001_v43 = vsel %vm865_vm11, %v1000_v3, %v996_v44 }
 0x48b   :  { %v1005_v26 = vrot.slane %v806_v10, %v1961_v36  ;;  %v1170_v36 = vld [vmem:[#allocation13 + $0x18] sm:$0xff] }
 0x48c   :  { %v1378_v25 = vpack.c.bf16 %v1170_v36, %v1169_v41 }
 0x48d   :  { %v1006_v27 = vsel %vm872_vm12, %v1005_v26, %v1001_v43 }
 0x48e   :  { %v1013_v56 = vsel %vm600_vm8, %v1006_v27, %v1012_v35 }
 0x48f   :  { %1332 = vmatmul.mubr.msk.f32.vlgmr.msra.gmra.mrb[0].mxu1 %vm118_vm1, %v1013_v56 }
 0x490   :  { %1353 = vmatprep.mubr.msk.f32.mxu1 %vm1546_vm0, %v2092_v53  ;;  %1376 = vmatpush3.bf16.msra.mxu1 %v1375_v63 }
 0x491   :  { %1377 = vmatprep.subr.bf16.mxu1 %v2090_v1 }
 0x494   :  { %1379 = vmatpush3.bf16.msra.mxu1 %v1378_v25 }
 0x55a   :  { %v1154_v0 = vpop.f32.mrb[2].mxu0 }
 0x55b   :  { %v1344_v40 = vpop.f32.mrb[3].mxu0 }
 0x562   :  { %v1082_v62 = vpop.f32.mrb[0].mxu1 }
 0x563   :  { %v1155_v51 = vadd.f32 %v1154_v0, %v1082_v62  ;;  %v1333_v54 = vpop.f32.mrb[1].mxu1 }
 0x565   :  { %v1165_v47 = vadd.f32 %v1289_v38, %v1155_v51 }
 0x567   :  { %1405 = vtanh.f32 %v1165_v47 }
 0x571   :  { %v1406_v57 = vpop.eup %1405 }
 0x572   :  { %1354 = vmatmul.mubr.msk.f32.vlgmr.msra.gmra.mrb[2].mxu1 %vm118_vm1, %v1406_v57 }
 0x645   :  { %v1247_v1 = vpop.f32.mrb[2].mxu1 }
 0x646   :  { %v1248_v48 = vadd.f32 %v1290_v4, %v1247_v1  ;;  %v1355_v34 = vpop.f32.mrb[3].mxu1 }
 0x648   :  { %1251 = vst [vmem:[%s2065_s11] sm:$0xff] %v1248_v48 }
 0x649   :  { %1266 = vsyncpa [#allocation7], 1 }
 0x64a   :  { %1267 = vsyncpa [#allocation9], 1 }
 0x64b   :  { %1268 = vsyncpa [#allocation12], 1 }

</bundles_post_ra>
